<compile_context>
chip_gen: v6e
topology: v6e:2x2x1
jax: 0.10.0
libtpu: 0.0.40
codegen_flags: <defaults>
</compile_context>

<pallas_src>
import jax
import jax.numpy as jnp
from jax.experimental import pallas as pl
from jax.experimental.pallas import tpu as pltpu

IN_FEATURES = 28 * 28          # 784
IN_PAD = 896                   # 7 * 128 (lane-aligned contraction dim, layer 1)
HIDDEN = 512
OUT_FEATURES = 10
OUT_PAD = 128                  # lane-dense output; extra cols are zero, sliced off


def _round_up(x, m):
    return (x + m - 1) // m * m


def mlp_kernel(x_ref, w1_ref, b1_ref, w2_ref, b2_ref, w3_ref, b3_ref, o_ref):
    # x_ref: (TM, 896) bf16 tile; weights bf16; biases f32 (1, N).
    x = x_ref[...]

    # Layer 1: MXU bf16 x bf16 -> f32; bias + ReLU in f32 on the VPU.
    h1 = jnp.dot(x, w1_ref[...], preferred_element_type=jnp.float32)
    h1 = jnp.maximum(h1 + b1_ref[...], 0.0)

    # Layer 2.
    h2 = jnp.dot(h1.astype(jnp.bfloat16), w2_ref[...],
                 preferred_element_type=jnp.float32)
    h2 = jnp.maximum(h2 + b2_ref[...], 0.0)

    # Layer 3 (output padded to 128 lanes; padding cols are exactly 0 after ReLU).
    h3 = jnp.dot(h2.astype(jnp.bfloat16), w3_ref[...],
                 preferred_element_type=jnp.float32)
    h3 = jnp.maximum(h3 + b3_ref[...], 0.0)

    o_ref[...] = h3.astype(o_ref.dtype)


def neural_network_forward(x_nchw, params, *, tm=None):
    """x_nchw: (B, 1, 28, 28) float32. Returns (B, 10) float32 logits."""
    w1, b1, w2, b2, w3, b3 = params
    B = x_nchw.shape[0]

    # nn.Flatten(): flatten all dims but batch, row-major (matches PyTorch),
    # then cast to bf16 for the MXU and zero-pad K 784 -> 896 (W1 rows
    # 784..895 are zero too, so the result is unchanged).
    x = x_nchw.reshape(B, -1).astype(jnp.bfloat16)
    x = jnp.pad(x, ((0, 0), (0, IN_PAD - x.shape[1])))

    # Batch tile: 256 fills the v6e/v7x MXU; round tiny batches up to the
    # sublane multiple of 8.
    if tm is None:
        tm = min(256, _round_up(B, 8))
    bp = _round_up(B, tm)
    if bp != B:
        x = jnp.pad(x, ((0, bp - B), (0, 0)))

    grid = (bp // tm,)

    # Weights/biases: block == full array, index_map constant -> VMEM-resident
    # across all grid steps (no re-DMA per batch tile).
    resident = lambda shape: pl.BlockSpec(shape, lambda i: (0, 0))

    out = pl.pallas_call(
        mlp_kernel,
        out_shape=jax.ShapeDtypeStruct((bp, OUT_PAD), jnp.float32),
        grid=grid,
        in_specs=[
            pl.BlockSpec((tm, IN_PAD), lambda i: (i, 0)),   # x: tiled over batch
            resident(w1.shape), resident(b1.shape),
            resident(w2.shape), resident(b2.shape),
            resident(w3.shape), resident(b3.shape),
        ],
        out_specs=pl.BlockSpec((tm, OUT_PAD), lambda i: (i, 0)),
        compiler_params=pltpu.CompilerParams(
            dimension_semantics=("parallel",),   # v7x: shard batch over 2 TCs
            vmem_limit_bytes=16 << 20,
        ),
    )(x, w1, b1, w2, b2, w3, b3)

    # Drop batch padding and the zero-padded output lanes.
    return out[:B, :OUT_FEATURES]


def init_params(key):
    """Deterministic init mimicking nn.Linear's uniform(-1/sqrt(fan_in), +...).

    Weights stored transposed vs PyTorch -> (in_features, out_features), bf16,
    with layer-1 rows padded 784->896 (zeros) and layer-3 cols padded 10->128
    (zeros). Biases stored as (1, out) f32 (layer-3 padded to 128 with zeros).
    """
    dims = [(IN_FEATURES, HIDDEN), (HIDDEN, HIDDEN), (HIDDEN, OUT_FEATURES)]
    params = []
    for fan_in, fan_out in dims:
        kw, kb, key = jax.random.split(key, 3)
        bound = 1.0 / jnp.sqrt(jnp.float32(fan_in))
        w = jax.random.uniform(kw, (fan_in, fan_out), jnp.float32, -bound, bound)
        b = jax.random.uniform(kb, (1, fan_out), jnp.float32, -bound, bound)
        params.append((w, b))
    (w1, b1), (w2, b2), (w3, b3) = params

    # Lane-alignment padding (zeros -> numerically a no-op).
    w1 = jnp.pad(w1, ((0, IN_PAD - IN_FEATURES), (0, 0)))
    w3 = jnp.pad(w3, ((0, 0), (0, OUT_PAD - OUT_FEATURES)))
    b3 = jnp.pad(b3, ((0, 0), (0, OUT_PAD - OUT_FEATURES)))

    to_bf16 = lambda w: w.astype(jnp.bfloat16)
    return (to_bf16(w1), b1, to_bf16(w2), b2, to_bf16(w3), b3)


def _reference_forward(x_nchw, params):
    """Pure-JAX reference using identical bf16/f32 mixed precision."""
    w1, b1, w2, b2, w3, b3 = params
    x = x_nchw.reshape(x_nchw.shape[0], -1).astype(jnp.bfloat16)
    x = jnp.pad(x, ((0, 0), (0, IN_PAD - x.shape[1])))
    h = jnp.maximum(jnp.dot(x, w1, preferred_element_type=jnp.float32) + b1, 0.0)
    h = jnp.maximum(jnp.dot(h.astype(jnp.bfloat16), w2,
                            preferred_element_type=jnp.float32) + b2, 0.0)
    h = jnp.maximum(jnp.dot(h.astype(jnp.bfloat16), w3,
                            preferred_element_type=jnp.float32) + b3, 0.0)
    return h[:, :OUT_FEATURES]


if __name__ == "__main__":
    key = jax.random.PRNGKey(0)
    k_x, k_p = jax.random.split(key)

    batch = 16
    x = jax.random.normal(k_x, (batch, 1, 28, 28), dtype=jnp.float32)  # NCHW
    params = init_params(k_p)

    # tm=8 so the tiny test exercises a multi-step batch grid (grid=(2,));
    # production use leaves tm=None (auto -> up to 256).
    logits = neural_network_forward(x, params, tm=8)
    jax.block_until_ready(logits)

    assert logits.shape == (batch, OUT_FEATURES), logits.shape
    assert logits.dtype == jnp.float32
    # Final ReLU (present in the reference nn.Sequential) => non-negative outputs.
    assert bool(jnp.all(logits >= 0.0))

    ref = _reference_forward(x, params)
    assert bool(jnp.allclose(logits, ref, atol=2e-2, rtol=2e-2)), (
        float(jnp.max(jnp.abs(logits - ref))))

    # Also exercise the default (single-tile) tiling path.
    logits_auto = neural_network_forward(x, params)
    jax.block_until_ready(logits_auto)
    assert bool(jnp.allclose(logits_auto, ref, atol=2e-2, rtol=2e-2))

    print("KERNEL_OK")
</pallas_src>

<mosaic_0001>
module attributes {stable_mosaic.version = 11 : i64} {
  func.func @mlp_kernel(%arg0: i32, %arg1: memref<8x896xbf16, #tpu.memory_space<vmem>>, %arg2: memref<896x512xbf16, #tpu.memory_space<vmem>>, %arg3: memref<1x512xf32, #tpu.memory_space<vmem>>, %arg4: memref<512x512xbf16, #tpu.memory_space<vmem>>, %arg5: memref<1x512xf32, #tpu.memory_space<vmem>>, %arg6: memref<512x128xbf16, #tpu.memory_space<vmem>>, %arg7: memref<1x128xf32, #tpu.memory_space<vmem>>, %arg8: memref<8x128xf32, #tpu.memory_space<vmem>>) attributes {dimension_semantics = [#tpu.dimension_semantics<parallel>], iteration_bounds = array<i64: 2>, scalar_prefetch = 0 : i64, scratch_operands = 0 : i64, tpu.core_type = #tpu.core_type<tc>, window_params = [{transform_indices = @transform_0, window_bounds = array<i64: 8, 896>}, {pipeline_mode = #tpu.pipeline_mode<synchronous>, transform_indices = @transform_1, window_bounds = array<i64: 896, 512>}, {pipeline_mode = #tpu.pipeline_mode<synchronous>, transform_indices = @transform_2, window_bounds = array<i64: 1, 512>}, {pipeline_mode = #tpu.pipeline_mode<synchronous>, transform_indices = @transform_3, window_bounds = array<i64: 512, 512>}, {pipeline_mode = #tpu.pipeline_mode<synchronous>, transform_indices = @transform_4, window_bounds = array<i64: 1, 512>}, {pipeline_mode = #tpu.pipeline_mode<synchronous>, transform_indices = @transform_5, window_bounds = array<i64: 512, 128>}, {pipeline_mode = #tpu.pipeline_mode<synchronous>, transform_indices = @transform_6, window_bounds = array<i64: 1, 128>}, {transform_indices = @transform_7, window_bounds = array<i64: 8, 128>}]} {
    %c0 = arith.constant 0 : index
    %c0_0 = arith.constant 0 : index
    %0 = vector.load %arg1[%c0, %c0_0] : memref<8x896xbf16, #tpu.memory_space<vmem>>, vector<8x896xbf16>
    %c0_1 = arith.constant 0 : index
    %c0_2 = arith.constant 0 : index
    %1 = vector.load %arg2[%c0_1, %c0_2] : memref<896x512xbf16, #tpu.memory_space<vmem>>, vector<896x512xbf16>
    %cst = arith.constant dense<0.000000e+00> : vector<8x512xf32>
    %2 = tpu.matmul %0, %1, %cst {dimension_numbers = #tpu.dot_dimension_numbers<[1], [0], [0], [1], [0, 0, 1, 1], [], []>} : vector<8x896xbf16>, vector<896x512xbf16>, vector<8x512xf32> -> vector<8x512xf32>
    %c0_3 = arith.constant 0 : index
    %c0_4 = arith.constant 0 : index
    %3 = vector.load %arg3[%c0_3, %c0_4] : memref<1x512xf32, #tpu.memory_space<vmem>>, vector<1x512xf32>
    %4 = vector.broadcast %3 : vector<1x512xf32> to vector<8x512xf32>
    %5 = arith.addf %2, %4 : vector<8x512xf32>
    %cst_5 = arith.constant 0.000000e+00 : f32
    %6 = vector.broadcast %cst_5 : f32 to vector<8x512xf32>
    %7 = arith.maximumf %5, %6 : vector<8x512xf32>
    %8 = arith.truncf %7 : vector<8x512xf32> to vector<8x512xbf16>
    %c0_6 = arith.constant 0 : index
    %c0_7 = arith.constant 0 : index
    %9 = vector.load %arg4[%c0_6, %c0_7] : memref<512x512xbf16, #tpu.memory_space<vmem>>, vector<512x512xbf16>
    %cst_8 = arith.constant dense<0.000000e+00> : vector<8x512xf32>
    %10 = tpu.matmul %8, %9, %cst_8 {dimension_numbers = #tpu.dot_dimension_numbers<[1], [0], [0], [1], [0, 0, 1, 1], [], []>} : vector<8x512xbf16>, vector<512x512xbf16>, vector<8x512xf32> -> vector<8x512xf32>
    %c0_9 = arith.constant 0 : index
    %c0_10 = arith.constant 0 : index
    %11 = vector.load %arg5[%c0_9, %c0_10] : memref<1x512xf32, #tpu.memory_space<vmem>>, vector<1x512xf32>
    %12 = vector.broadcast %11 : vector<1x512xf32> to vector<8x512xf32>
    %13 = arith.addf %10, %12 : vector<8x512xf32>
    %cst_11 = arith.constant 0.000000e+00 : f32
    %14 = vector.broadcast %cst_11 : f32 to vector<8x512xf32>
    %15 = arith.maximumf %13, %14 : vector<8x512xf32>
    %16 = arith.truncf %15 : vector<8x512xf32> to vector<8x512xbf16>
    %c0_12 = arith.constant 0 : index
    %c0_13 = arith.constant 0 : index
    %17 = vector.load %arg6[%c0_12, %c0_13] : memref<512x128xbf16, #tpu.memory_space<vmem>>, vector<512x128xbf16>
    %cst_14 = arith.constant dense<0.000000e+00> : vector<8x128xf32>
    %18 = tpu.matmul %16, %17, %cst_14 {dimension_numbers = #tpu.dot_dimension_numbers<[1], [0], [0], [1], [0, 0, 1, 1], [], []>} : vector<8x512xbf16>, vector<512x128xbf16>, vector<8x128xf32> -> vector<8x128xf32>
    %c0_15 = arith.constant 0 : index
    %c0_16 = arith.constant 0 : index
    %19 = vector.load %arg7[%c0_15, %c0_16] : memref<1x128xf32, #tpu.memory_space<vmem>>, vector<1x128xf32>
    %20 = vector.broadcast %19 : vector<1x128xf32> to vector<8x128xf32>
    %21 = arith.addf %18, %20 : vector<8x128xf32>
    %cst_17 = arith.constant 0.000000e+00 : f32
    %22 = vector.broadcast %cst_17 : f32 to vector<8x128xf32>
    %23 = arith.maximumf %21, %22 : vector<8x128xf32>
    %c0_18 = arith.constant 0 : index
    %c0_19 = arith.constant 0 : index
    %24 = vector.load %arg8[%c0_18, %c0_19] : memref<8x128xf32, #tpu.memory_space<vmem>>, vector<8x128xf32>
    tpu.vector_store %arg8[%c0_18, %c0_19], %23 {strides = array<i32>} : memref<8x128xf32, #tpu.memory_space<vmem>>, vector<8x128xf32>,
    return
  }
  func.func @transform_0(%arg0: i32) -> (i32, i32) {
    %c0_i32 = arith.constant 0 : i32
    %c0_i32_0 = arith.constant 0 : i32
    return %arg0, %c0_i32 : i32, i32
  }
  func.func @transform_1(%arg0: i32) -> (i32, i32) {
    %c0_i32 = arith.constant 0 : i32
    %c0_i32_0 = arith.constant 0 : i32
    %c0_i32_1 = arith.constant 0 : i32
    return %c0_i32, %c0_i32_0 : i32, i32
  }
  func.func @transform_2(%arg0: i32) -> (i32, i32) {
    %c0_i32 = arith.constant 0 : i32
    %c0_i32_0 = arith.constant 0 : i32
    %c0_i32_1 = arith.constant 0 : i32
    return %c0_i32, %c0_i32_0 : i32, i32
  }
  func.func @transform_3(%arg0: i32) -> (i32, i32) {
    %c0_i32 = arith.constant 0 : i32
    %c0_i32_0 = arith.constant 0 : i32
    %c0_i32_1 = arith.constant 0 : i32
    return %c0_i32, %c0_i32_0 : i32, i32
  }
  func.func @transform_4(%arg0: i32) -> (i32, i32) {
    %c0_i32 = arith.constant 0 : i32
    %c0_i32_0 = arith.constant 0 : i32
    %c0_i32_1 = arith.constant 0 : i32
    return %c0_i32, %c0_i32_0 : i32, i32
  }
  func.func @transform_5(%arg0: i32) -> (i32, i32) {
    %c0_i32 = arith.constant 0 : i32
    %c0_i32_0 = arith.constant 0 : i32
    %c0_i32_1 = arith.constant 0 : i32
    return %c0_i32, %c0_i32_0 : i32, i32
  }
  func.func @transform_6(%arg0: i32) -> (i32, i32) {
    %c0_i32 = arith.constant 0 : i32
    %c0_i32_0 = arith.constant 0 : i32
    %c0_i32_1 = arith.constant 0 : i32
    return %c0_i32, %c0_i32_0 : i32, i32
  }
  func.func @transform_7(%arg0: i32) -> (i32, i32) {
    %c0_i32 = arith.constant 0 : i32
    %c0_i32_0 = arith.constant 0 : i32
    return %arg0, %c0_i32 : i32, i32
  }
}

</mosaic_0001>

<bundles_post_ra>
// kernel: tpu_custom_call.1
= control target key start
LH: loop header
LB: loop body
LE: loop exit
PB: predicated region body
PF: predicated region fallthrough
CT: control target
= control target key end

     0   :  { %s5177_s0 = inlined_call_operand.hbm [shape: bf16[16,896], index: 0, kind: input, shape index: {}]   ;;  %s5178_s1 = inlined_call_operand.hbm [shape: bf16[896,512], index: 1, kind: input, shape index: {}]   ;;  %s5179_s2 = inlined_call_operand.hbm [shape: f32[1,512], index: 2, kind: input, shape index: {}]   ;;  %s5180_s3 = inlined_call_operand.hbm [shape: bf16[512,512], index: 3, kind: input, shape index: {}]   ;;  %s5181_s4 = inlined_call_operand.vmem [shape: f32[1,512], index: 4, kind: input, shape index: {}]   ;;  %s5182_s5 = inlined_call_operand.hbm [shape: bf16[512,128], index: 5, kind: input, shape index: {}]   ;;  %s5183_s6 = inlined_call_operand.vmem [shape: f32[1,128], index: 6, kind: input, shape index: {}]   ;;  %s5184_s7 = inlined_call_operand.hbm [shape: f32[16,128], index: 7, kind: output, shape index: {}]  }
   0x1   :  { %5189 = sst [smem:[#allocation16_spill]] %s5178_s1 }
   0x2   :  { %5190 = sst [smem:[#allocation17_spill]] %s5179_s2 }
   0x3   :  { %12 = vsyncpa [#allocation3], 0 }
   0x4   :  { %14 = vsyncpa [#allocation3 + $0x1], 0 }
   0x5   :  { %15 = vsyncpa [#allocation6], 0 }
   0x6   :  { %16 = vsyncpa [#allocation9], 0 }
   0x7   :  { %17 = vsyncpa [#allocation4], 0 }
   0x8   :  { %19 = vsyncpa [#allocation4 + $0x1], 0  ;;  %s4886_s24 = smov 0   ;;  %s4888_s25 = smov 0  }
   0x9   :  { %s4890_s26 = smov 0   ;;  %s4892_s27 = smov 0  }
   0xa LB: > { %s4835_s28 = smov [#allocation5]   ;;  %s4907_s30 = sadd.s32 4294967295, %s4833_s27   ;;  %s4833_s27 = sphi %s4892_s27, %s5211_s27   ;;  %s4829_s26 = sphi %s4890_s26, %s5210_s26   ;;  %s4825_s25 = sphi %s4888_s25, %s5209_s25   ;;  %s4821_s24 = sphi %s4886_s24, %s5208_s24  }
   0xb   : > { %s220_s29 = sshll.u32 %s4835_s28, 4  ;;  %p3513_p0 = scmp.ge.s32.totalorder %s4833_s27, 1  ;;  %s221_s29 = int_to_ptr.vmem [resolvable:$true] %s220_s29 }
   0xc   : > { %p5185_p1 = scmp.eq.s32.totalorder %s4907_s30, 0  ;;  %p208_p2 = scmp.lt.s32.totalorder %s4833_s27, 3 }
   0xd   : > { %s4836_s9 = smov [#allocation8]   ;;  %s4837_s12 = smov [#allocation7]  }
   0xe   : > { %p4912_p3 = pnand %p3513_p0, %p208_p2  ;;  %s244_s10 = sshll.u32 %s4836_s9, 4  ;;  %s4925_s10 = int_to_ptr.vmem [resolvable:$true] %s244_s10 }
   0xf   : > { %s234_s13 = sshll.u32 %s4837_s12, 4  ;;  %s4640_s14 = scalar_lea.vmem %s221_s29, 28672  ;;  %s4927_s13 = int_to_ptr.vmem [resolvable:$true] %s234_s13 }
  0x10   : > { %s5191_s8 = scalar_select %p4912_p3, 1, 0 }
  0x11   : > { %p3989_p5 = pneg %p4912_p3  ;;  %p4641_p8 = scmp.ne.s32.totalorder %s221_s29, %s4640_s14 }
  0x12   : > { %p4648_p11 = scmp.lt.s32.totalorder %s221_s29, %s221_s29  ;;  %p4649_p12 = scmp.lt.s32.totalorder %s4640_s14, %s4640_s14 }
  0x13   : > { %p4921_p6 = pnand %p3989_p5, %p5185_p1 }
  0x14   : > { %p4650_p13 = por %p4649_p12, %p4648_p11 }
  0x15   : > { %p4631_p7 = pneg %p4921_p6 }
  0x17   : > { %p4643_p9 = pnand %p4641_p8, %p4631_p7 }
  0x19   : > { %p4644_p10 = pneg %p4643_p9 }
  0x1b   : > { %p4651_p0 = pnand %p4650_p13, %p4644_p10 }
  0x1d   : > { %4654 = shalt.err (!%p4651_p0)
}
  0x1e   : > { %s4838_s15 = smov 256   ;;  %s4839_s16 = smov 16  }
  0x1f   : > { %s5193_s1 = sld [smem:[#allocation16_spill]]  ;;  %s4666_s19 = scalar_lea.vmem %s4925_s10, 16384 }
  0x20   : > { %p4667_p2 = scmp.ne.s32.totalorder %s4925_s10, %s4666_s19  ;;  %p4674_p9 = scmp.lt.s32.totalorder %s4925_s10, %s4925_s10 }
  0x21   : > { %p4675_p10 = scmp.lt.s32.totalorder %s4666_s19, %s4666_s19 }
  0x22   : > { %p4669_p5 = pnand %p4667_p2, %p4631_p7 }
  0x23   : > { %p4676_p11 = por %p4675_p10, %p4674_p9 }
  0x24   : > { %p4670_p8 = pneg %p4669_p5 }
  0x25   : > { %3992 = dma.hbm_to_vmem [thread:$0]  (!%p4921_p6), %s5193_s1, 28672, %s221_s29, [#allocation6], %s4838_s15, %s4838_s15, %s4839_s16  }
  0x26   : > { %p4677_p12 = pnand %p4676_p11, %p4670_p8 }
  0x28   : > { %4680 = shalt.err (!%p4677_p12)
}
  0x29   : > { %3998 = dma.hbm_to_vmem [thread:$0]  (!%p4921_p6), %s5180_s3, 16384, %s4925_s10, [#allocation9], %s4838_s15, %s4838_s15, %s4839_s16  }
  0x2a   : > { %s4692_s22 = scalar_lea.vmem %s4927_s13, 64  ;;  %p4700_p5 = scmp.lt.s32.totalorder %s4927_s13, %s4927_s13 }
  0x2b   : > { %p4693_p13 = scmp.ne.s32.totalorder %s4927_s13, %s4692_s22  ;;  %p4701_p8 = scmp.lt.s32.totalorder %s4692_s22, %s4692_s22 }
  0x2d   : > { %p4695_p0 = pnand %p4693_p13, %p4631_p7  ;;  %p4702_p9 = por %p4701_p8, %p4700_p5 }
  0x2f   : > { %p4696_p2 = pneg %p4695_p0 }
  0x31   : > { %p4703_p10 = pnand %p4702_p9, %p4696_p2 }
  0x33   : > { %4706 = shalt.err (!%p4703_p10)
}
  0x34   : > { %s5194_s2 = sld [smem:[#allocation17_spill]]  ;;  %s4840_s29 = smov [#allocation10]  }
  0x35   : > { %s260_s9 = sshll.u32 %s4840_s29, 4  ;;  %s261_s9 = int_to_ptr.vmem [resolvable:$true] %s260_s9 }
  0x36   : > { %s4718_s10 = scalar_lea.vmem %s261_s9, 4096  ;;  %p4726_p0 = scmp.lt.s32.totalorder %s261_s9, %s261_s9 }
  0x37   : > { %p4719_p11 = scmp.ne.s32.totalorder %s261_s9, %s4718_s10  ;;  %p4727_p2 = scmp.lt.s32.totalorder %s4718_s10, %s4718_s10 }
  0x39   : > { %p4721_p12 = pnand %p4719_p11, %p4631_p7  ;;  %p4728_p5 = por %p4727_p2, %p4726_p0 }
  0x3a   : > { %3995 = dma.hbm_to_vmem [thread:$0]  (!%p4921_p6), %s5194_s2, 64, %s4927_s13, [#allocation6]  }
  0x3b   : > { %p4722_p13 = pneg %p4721_p12 }
  0x3d   : > { %p4729_p8 = pnand %p4728_p5, %p4722_p13 }
  0x3f   : > { %4732 = shalt.err (!%p4729_p8)
}
  0x40   : > { %s4841_s12 = smov 64   ;;  %s4842_s13 = smov 4  }
  0x41   : > { %4001 = dma.hbm_to_vmem [thread:$0]  (!%p4921_p6), %s5182_s5, 4096, %s261_s9, [#allocation9], %s4841_s12, %s4841_s12, %s4842_s13  }
  0x42   : > { %s3512_s16 = sadd.s32 4294967294, %s4833_s27   ;;  %s4975_s17 = sadd.s32 1, %s4833_s27  }
  0x43   : > { %s29_s18 = ssub.s32 %s4833_s27, %s4975_s17  ;;  %s32_s19 = sadd.s32 1, %s4829_s26 }
  0x44   : > { %p30_p7 = scmp.eq.s32.totalorder %s29_s18, 0  ;;  %p39_p9 = scmp.ne.s32.totalorder %s4829_s26, %s4825_s25 }
  0x45   : > { %p40_p10 = scmp.eq.s32.totalorder %s4833_s27, 0  ;;  %p45_p11 = scmp.ne.s32.totalorder %s4825_s25, %s4821_s24 }
  0x46   : > { %s4986_s20 = scalar_select %p30_p7, %s4829_s26, %s32_s19  }
  0x47   : > { %p41_p12 = por %p40_p10, %p39_p9  ;;  %p4990_p13 = por %p5185_p1, %p45_p11 }
  0x48   : > { %p195_p6 = scmp.eq.s32.totalorder %s4907_s30, 1  ;;  %p201_p0 = scmp.eq.s32.totalorder %s3512_s16, 1 }
  0x49   : > { %s5195_s11 = scalar_select %p4990_p13, 1, 0 }
  0x4a   : > { %p4014_p2 = scmp.lt.s32.totalorder %s4833_s27, 2  ;;  %s277_s21 = sand.u32 1, %s4829_s26  }
  0x4b   : > { %p4997_p5 = por %p195_p6, %p39_p9  ;;  %p5001_p8 = por %p201_p0, %p45_p11 }
  0x4c   : > { %s3966_s28 = smul.u32 28, %s277_s21  ;;  %p5006_p7 = pnand %p4014_p2, %p41_p12 }
  0x4d   : > { %s5196_s22 = scalar_select %p4997_p5, 1, 0 }
  0x4e   : > { %s5197_s23 = scalar_select %p5001_p8, 1, 0 }
  0x4f   : > { %s3967_s29 = smul.u32 448, %s4833_s27  ;;  %s281_s14 = scalar_lea.vmem [#allocation2], %s3966_s28 }
  0x50   : > { %s289_s15 = sshll.u32 %s281_s14, 4  ;;  %s278_s16 = scalar_lea.sflag [#allocation3], %s277_s21  ;;  %s290_s15 = int_to_ptr.vmem [resolvable:$true] %s289_s15 }
  0x51   : > { %s5013_s13 = scalar_lea.hbm %s5177_s0, %s3967_s29  ;;  %p4735_p10 = pneg %p5006_p7 }
  0x52   : > { %s4733_s18 = scalar_lea.hbm %s5013_s13, 448  ;;  %s4738_s10 = scalar_lea.hbm %s5177_s0, 896 }
  0x53   : > { %p4734_p9 = scmp.ne.s32.totalorder %s5013_s13, %s4733_s18  ;;  %p4739_p6 = scmp.lt.s32.totalorder %s5013_s13, %s5177_s0 }
  0x54   : > { %p4740_p0 = scmp.lt.s32.totalorder %s4738_s10, %s4733_s18 }
  0x55   : > { %p4736_p11 = pnand %p4735_p10, %p4734_p9 }
  0x56   : > { %p4741_p2 = por %p4740_p0, %p4739_p6 }
  0x57   : > { %p4737_p12 = pneg %p4736_p11 }
  0x59   : > { %p4742_p4 = pnand %p4741_p2, %p4737_p12 }
  0x5b   : > { %4745 = shalt.err (!%p4742_p4)
}
  0x5c   : > { %s4746_s28 = scalar_lea.vmem %s290_s15, 448  ;;  %s4843_s21 = smov [#allocation2]  }
  0x5d   : > { %p4747_p1 = scmp.ne.s32.totalorder %s290_s15, %s4746_s28  ;;  %s4751_s14 = sshll.u32 %s4843_s21, 4  ;;  %s4752_s14 = int_to_ptr.vmem [resolvable:$false] %s4751_s14 }
  0x5e   : > { %s4753_s2 = scalar_lea.vmem %s4752_s14, 896  ;;  %p4754_p9 = scmp.lt.s32.totalorder %s290_s15, %s4752_s14 }
  0x5f   : > { %p4749_p8 = pnand %p4747_p1, %p4735_p10  ;;  %p4755_p11 = scmp.lt.s32.totalorder %s4753_s2, %s4746_s28 }
  0x61   : > { %p4750_p5 = pneg %p4749_p8  ;;  %p4756_p13 = por %p4755_p11, %p4754_p9 }
  0x63   : > { %p4757_p3 = pnand %p4756_p13, %p4750_p5 }
  0x65   : > { %4760 = shalt.err (!%p4757_p3)
}
  0x66   : > { %4005 = dma.hbm_to_vmem [thread:$0]  (!%p5006_p7), %s5013_s13, 448, %s290_s15, %s278_s16  }
  0x67   : > { %p5199_p12 = scmp.ne.s32.totalorder %s5191_s8, 0 }
  0x68   : > { %s5032_s1 = sand.u32 (!%p5199_p12), 1, %s4825_s25   ;;  %p5200_p1 = scmp.ne.s32.totalorder (!%p5199_p12), %s5195_s11, 0 }
  0x69   : > { %298 = sbr.rel (%p5199_p12) target bundleno = 1027 (0x403), region = 48  ;;  %s301_s19 = scalar_lea.sflag (!%p5199_p12), [#allocation3], %s5032_s1 }
  0x6a   : > { %s3968_s18 = smul.u32 (!%p5199_p12), 28, %s5032_s1 }
  0x6c   : > { %s5036_s10 = scalar_lea.vmem (!%p5199_p12), [#allocation2], %s3968_s18 }
  0x6e   : > { %4804 = dma.done.wait (%p5200_p1), %s301_s19, 448  }
  0x6f   : > { %4806 = vsyncadd (%p5200_p1), %s301_s19, 4294966848  ;;  %p5201_p3 = scmp.eq.s32.totalorder %s4907_s30, 0 }
  0x71   : > { %4808 = dma.done.wait (%p5201_p3), [#allocation6], 28736   ;;  %p5202_p4 = pmov %p5201_p3 }
  0x72   : > { %p5203_p13 = pmov %p5201_p3 }
  0x73   : > { %4810 = vsyncadd (%p5202_p4), [#allocation6], 4294938560 }
  0x74   : > { %4812 = dma.done.wait (%p5203_p13), [#allocation9], 20480   ;;  %p5204_p5 = pmov %p5201_p3 }
  0x75   : > { %v4061_v0 = vld [vmem:[#allocation5 + $0xe4] ss:$16 sps:$4 sm:$0xff]   ;;  %v4065_v2 = vld [vmem:[#allocation5 + $0xe0] ss:$16 sps:$4 sm:$0xff]   ;;  %s3525_s11 = sshll.u32 %s5032_s1, 3  ;;  %s3919_s15 = sshll.u32 %s4907_s30, 7 }
  0x76   : > { %4814 = vsyncadd (%p5204_p5), [#allocation9], 4294946816  ;;  %v4063_v1 = vld [vmem:[#allocation5 + $0x2e4] ss:$16 sps:$4 sm:$0xff]   ;;  %1747 = vmatprep.subr.bf16.mxu0 %v4061_v0  ;;  %v4066_v3 = vld [vmem:[#allocation5 + $0x2e0] ss:$16 sps:$4 sm:$0xff]   ;;  %s3402_s21 = scalar_lea.hbm %s5184_s7, %s3919_s15 }
  0x77   : > { %1788 = vmatprep.subr.bf16.mxu1 %v4063_v1  ;;  %v4067_v4 = vld [vmem:[#allocation5 + $0xc4] ss:$16 sps:$4 sm:$0xff]   ;;  %1748 = vmatpush1.bf16.msra.mxu0 %v4065_v2  ;;  %v4071_v6 = vld [vmem:[#allocation5 + $0xc0] ss:$16 sps:$4 sm:$0xff]   ;;  %s350_s16 = scalar_lea.vmem [#allocation11], %s3525_s11  ;;  %s3391_s14 = scalar_lea.sflag [#allocation4], %s5032_s1 }
  0x78   : > { %1789 = vmatpush1.bf16.msra.mxu1 %v4066_v3  ;;  %v4069_v5 = vld [vmem:[#allocation5 + $0x2c4] ss:$16 sps:$4 sm:$0xff]   ;;  %1749 = vmatprep.subr.bf16.mxu0 %v4067_v4  ;;  %v4072_v7 = vld [vmem:[#allocation5 + $0x2c0] ss:$16 sps:$4 sm:$0xff]   ;;  %s3404_s12 = sshll.u32 %s350_s16, 4  ;;  %p5205_p7 = scmp.ne.s32.totalorder %s5196_s22, 0  ;;  %s3405_s12 = int_to_ptr.vmem [resolvable:$true] %s3404_s12 }
  0x79   : > { %1790 = vmatprep.subr.bf16.mxu1 %v4069_v5  ;;  %v4073_v8 = vld [vmem:[#allocation5 + $0xa4] ss:$16 sps:$4 sm:$0xff]   ;;  %v4077_v10 = vld [vmem:[#allocation5 + $0xa0] ss:$16 sps:$4 sm:$0xff]   ;;  %s4761_s18 = scalar_lea.vmem %s3405_s12, 128  ;;  %s4845_s19 = smov [#allocation11]  }
  0x7a   : > { %v4075_v9 = vld [vmem:[#allocation5 + $0x2a4] ss:$16 sps:$4 sm:$0xff]   ;;  %v4078_v11 = vld [vmem:[#allocation5 + $0x2a0] ss:$16 sps:$4 sm:$0xff]   ;;  %p4762_p8 = scmp.ne.s32.totalorder %s3405_s12, %s4761_s18 }
  0x7b   : > { %1750 = vmatpush1.bf16.msra.mxu0 %v4071_v6  ;;  %v4079_v12 = vld [vmem:[#allocation5 + $0x84] ss:$16 sps:$4 sm:$0xff]   ;;  %v4083_v14 = vld [vmem:[#allocation5 + $0x80] ss:$16 sps:$4 sm:$0xff]  }
  0x7c   : > { %1791 = vmatpush1.bf16.msra.mxu1 %v4072_v7  ;;  %1751 = vmatprep.subr.bf16.mxu0 %v4073_v8  ;;  %v4081_v13 = vld [vmem:[#allocation5 + $0x284] ss:$16 sps:$4 sm:$0xff]   ;;  %v4084_v15 = vld [vmem:[#allocation5 + $0x280] ss:$16 sps:$4 sm:$0xff]   ;;  %p4763_p10 = pnand %p4762_p8, %p5205_p7 }
  0x7d   : > { %1792 = vmatprep.subr.bf16.mxu1 %v4075_v9  ;;  %v4085_v16 = vld [vmem:[#allocation5 + $0x64] ss:$16 sps:$4 sm:$0xff]   ;;  %v4089_v18 = vld [vmem:[#allocation5 + $0x60] ss:$16 sps:$4 sm:$0xff]  }
  0x7e   : > { %v4087_v17 = vld [vmem:[#allocation5 + $0x264] ss:$16 sps:$4 sm:$0xff]   ;;  %v4090_v19 = vld [vmem:[#allocation5 + $0x260] ss:$16 sps:$4 sm:$0xff]   ;;  %p4764_p6 = pneg %p4763_p10 }
  0x7f   : > { %1752 = vmatpush1.bf16.msra.mxu0 %v4077_v10  ;;  %v4091_v20 = vld [vmem:[#allocation5 + $0x44] ss:$16 sps:$4 sm:$0xff]   ;;  %v4095_v22 = vld [vmem:[#allocation5 + $0x40] ss:$16 sps:$4 sm:$0xff]  }
  0x80   : > { %1793 = vmatpush1.bf16.msra.mxu1 %v4078_v11  ;;  %1753 = vmatprep.subr.bf16.mxu0 %v4079_v12  ;;  %v4093_v21 = vld [vmem:[#allocation5 + $0x244] ss:$16 sps:$4 sm:$0xff]   ;;  %v4096_v23 = vld [vmem:[#allocation5 + $0x240] ss:$16 sps:$4 sm:$0xff]  }
  0x81   : > { %1794 = vmatprep.subr.bf16.mxu1 %v4081_v13  ;;  %v4097_v24 = vld [vmem:[#allocation5 + $0x24] ss:$16 sps:$4 sm:$0xff]   ;;  %v4101_v26 = vld [vmem:[#allocation5 + $0x20] ss:$16 sps:$4 sm:$0xff]  }
  0x82   : > { %v4099_v25 = vld [vmem:[#allocation5 + $0x224] ss:$16 sps:$4 sm:$0xff]   ;;  %v4102_v27 = vld [vmem:[#allocation5 + $0x220] ss:$16 sps:$4 sm:$0xff]  }
  0x83   : > { %1754 = vmatpush1.bf16.msra.mxu0 %v4083_v14  ;;  %v4103_v28 = vld [vmem:[#allocation5 + $0x4] ss:$16 sps:$4 sm:$0xff]   ;;  %v4107_v30 = vld [vmem:[#allocation5] ss:$16 sps:$4 sm:$0xff]  }
  0x84   : > { %1795 = vmatpush1.bf16.msra.mxu1 %v4084_v15  ;;  %1755 = vmatprep.subr.bf16.mxu0 %v4085_v16  ;;  %v4105_v29 = vld [vmem:[#allocation5 + $0x204] ss:$16 sps:$4 sm:$0xff]   ;;  %v4108_v31 = vld [vmem:[#allocation5 + $0x200] ss:$16 sps:$4 sm:$0xff]   ;;  %v4844_v16 = vmov 0  }
  0x85   : > { %1796 = vmatprep.subr.bf16.mxu1 %v4087_v17  ;;  %v4109_v32 = vld [vmem:[#allocation5 + $0x1e4] ss:$16 sps:$4 sm:$0xff]   ;;  %v4113_v34 = vld [vmem:[#allocation5 + $0x1e0] ss:$16 sps:$4 sm:$0xff]  }
  0x86   : > { %v4111_v33 = vld [vmem:[#allocation5 + $0x3e4] ss:$16 sps:$4 sm:$0xff]   ;;  %v4114_v35 = vld [vmem:[#allocation5 + $0x3e0] ss:$16 sps:$4 sm:$0xff]  }
  0x87   : > { %1756 = vmatpush1.bf16.msra.mxu0 %v4089_v18  ;;  %v4115_v36 = vld [vmem:[#allocation5 + $0x1c4] ss:$16 sps:$4 sm:$0xff]   ;;  %v4119_v38 = vld [vmem:[#allocation5 + $0x1c0] ss:$16 sps:$4 sm:$0xff]  }
  0x88   : > { %1797 = vmatpush1.bf16.msra.mxu1 %v4090_v19  ;;  %1757 = vmatprep.subr.bf16.mxu0 %v4091_v20  ;;  %v4117_v37 = vld [vmem:[#allocation5 + $0x3c4] ss:$16 sps:$4 sm:$0xff]   ;;  %v4120_v39 = vld [vmem:[#allocation5 + $0x3c0] ss:$16 sps:$4 sm:$0xff]  }
  0x89   : > { %1798 = vmatprep.subr.bf16.mxu1 %v4093_v21  ;;  %v4121_v40 = vld [vmem:[#allocation5 + $0x1a4] ss:$16 sps:$4 sm:$0xff]   ;;  %v4125_v42 = vld [vmem:[#allocation5 + $0x1a0] ss:$16 sps:$4 sm:$0xff]  }
  0x8a   : > { %v4123_v41 = vld [vmem:[#allocation5 + $0x3a4] ss:$16 sps:$4 sm:$0xff]   ;;  %v4126_v43 = vld [vmem:[#allocation5 + $0x3a0] ss:$16 sps:$4 sm:$0xff]  }
  0x8b   : > { %1758 = vmatpush1.bf16.msra.mxu0 %v4095_v22  ;;  %v4127_v44 = vld [vmem:[#allocation5 + $0x184] ss:$16 sps:$4 sm:$0xff]   ;;  %v4131_v49 = vld [vmem:[#allocation5 + $0x180] ss:$16 sps:$4 sm:$0xff]  }
  0x8c   : > { %1799 = vmatpush1.bf16.msra.mxu1 %v4096_v23  ;;  %1759 = vmatprep.subr.bf16.mxu0 %v4097_v24  ;;  %v4129_v45 = vld [vmem:[#allocation5 + $0x384] ss:$16 sps:$4 sm:$0xff]   ;;  %v4132_v50 = vld [vmem:[#allocation5 + $0x380] ss:$16 sps:$4 sm:$0xff]  }
  0x8d   : > { %1800 = vmatprep.subr.bf16.mxu1 %v4099_v25  ;;  %v352_v46 = vld [vmem:[%s5036_s10] sm:$0xff]  ;;  %v353_v48 = vld [vmem:[%s5036_s10 + $0x8] sm:$0xff] }
  0x8e   : > { %v5051_v47 = vcombine.high %v352_v46, %v352_v46  ;;  %v5054_v51 = vcombine.high %v353_v48, %v353_v48  ;;  %v4133_v52 = vld [vmem:[#allocation5 + $0x164] ss:$16 sps:$4 sm:$0xff]   ;;  %v4137_v54 = vld [vmem:[#allocation5 + $0x160] ss:$16 sps:$4 sm:$0xff]   ;;  %v5058_v6 = vcombine.low %v352_v46, %v352_v46  ;;  %v5060_v7 = vcombine.low %v353_v48, %v353_v48  ;;  %v4221_v48 = vld [vmem:[#allocation5 + $0xcc] ss:$16 sps:$4 sm:$0xff]  }
  0x8f   : > { %1760 = vmatpush1.bf16.msra.mxu0 %v4101_v26  ;;  %v4135_v53 = vld [vmem:[#allocation5 + $0x364] ss:$16 sps:$4 sm:$0xff]   ;;  %v4138_v55 = vld [vmem:[#allocation5 + $0x360] ss:$16 sps:$4 sm:$0xff]  }
  0x90   : > { %1801 = vmatpush1.bf16.msra.mxu1 %v4102_v27  ;;  %1761 = vmatprep.subr.bf16.mxu0 %v4103_v28  ;;  %v4139_v56 = vld [vmem:[#allocation5 + $0x144] ss:$16 sps:$4 sm:$0xff]   ;;  %v4143_v58 = vld [vmem:[#allocation5 + $0x140] ss:$16 sps:$4 sm:$0xff]  }
  0x91   : > { %1802 = vmatprep.subr.bf16.mxu1 %v4105_v29  ;;  %1779 = vmatprep.mubr.bf16.mxu0 %v5051_v47  ;;  %v4141_v57 = vld [vmem:[#allocation5 + $0x344] ss:$16 sps:$4 sm:$0xff]   ;;  %v4144_v59 = vld [vmem:[#allocation5 + $0x340] ss:$16 sps:$4 sm:$0xff]  }
  0x92   : > { %1820 = vmatprep.mubr.bf16.mxu1 %v5054_v51  ;;  %v4145_v60 = vld [vmem:[#allocation5 + $0x124] ss:$16 sps:$4 sm:$0xff]   ;;  %v4149_v62 = vld [vmem:[#allocation5 + $0x120] ss:$16 sps:$4 sm:$0xff]  }
  0x93   : > { %1762 = vmatpush1.bf16.msra.mxu0 %v4107_v30  ;;  %v4147_v61 = vld [vmem:[#allocation5 + $0x324] ss:$16 sps:$4 sm:$0xff]   ;;  %v4150_v63 = vld [vmem:[#allocation5 + $0x320] ss:$16 sps:$4 sm:$0xff]  }
  0x94   : > { %1803 = vmatpush1.bf16.msra.mxu1 %v4108_v31  ;;  %1763 = vmatprep.subr.bf16.mxu0 %v4109_v32  ;;  %v4151_v0 = vld [vmem:[#allocation5 + $0x104] ss:$16 sps:$4 sm:$0xff]   ;;  %v4155_v2 = vld [vmem:[#allocation5 + $0x100] ss:$16 sps:$4 sm:$0xff]  }
  0x95   : > { %1804 = vmatprep.subr.bf16.mxu1 %v4111_v33  ;;  %v4153_v1 = vld [vmem:[#allocation5 + $0x304] ss:$16 sps:$4 sm:$0xff]   ;;  %v4156_v3 = vld [vmem:[#allocation5 + $0x300] ss:$16 sps:$4 sm:$0xff]  }
  0x96   : > { %v4163_v4 = vld [vmem:[#allocation5 + $0x4e4] ss:$16 sps:$4 sm:$0xff]   ;;  %v4161_v8 = vld [vmem:[#allocation5 + $0x4e0] ss:$16 sps:$4 sm:$0xff]  }
  0x97   : > { %1764 = vmatpush2.bf16.msra.mxu0 %v4113_v34  ;;  %v4166_v5 = vld [vmem:[#allocation5 + $0x6e4] ss:$16 sps:$4 sm:$0xff]   ;;  %v4164_v9 = vld [vmem:[#allocation5 + $0x6e0] ss:$16 sps:$4 sm:$0xff]  }
  0x98   : > { %1805 = vmatpush2.bf16.msra.mxu1 %v4114_v35  ;;  %1765 = vmatprep.subr.bf16.mxu0 %v4115_v36  ;;  %v4169_v10 = vld [vmem:[#allocation5 + $0x4c4] ss:$16 sps:$4 sm:$0xff]   ;;  %v4167_v12 = vld [vmem:[#allocation5 + $0x4c0] ss:$16 sps:$4 sm:$0xff]  }
  0x99   : > { %1806 = vmatprep.subr.bf16.mxu1 %v4117_v37  ;;  %v4172_v11 = vld [vmem:[#allocation5 + $0x6c4] ss:$16 sps:$4 sm:$0xff]   ;;  %v4170_v13 = vld [vmem:[#allocation5 + $0x6c0] ss:$16 sps:$4 sm:$0xff]  }
  0x9a   : > { %v4175_v14 = vld [vmem:[#allocation5 + $0x4a4] ss:$16 sps:$4 sm:$0xff]   ;;  %v4173_v17 = vld [vmem:[#allocation5 + $0x4a0] ss:$16 sps:$4 sm:$0xff]  }
  0x9b   : > { %1766 = vmatpush2.bf16.msra.mxu0 %v4119_v38  ;;  %v4178_v15 = vld [vmem:[#allocation5 + $0x6a4] ss:$16 sps:$4 sm:$0xff]   ;;  %v4176_v18 = vld [vmem:[#allocation5 + $0x6a0] ss:$16 sps:$4 sm:$0xff]  }
  0x9c   : > { %1807 = vmatpush2.bf16.msra.mxu1 %v4120_v39  ;;  %1767 = vmatprep.subr.bf16.mxu0 %v4121_v40  ;;  %v4181_v19 = vld [vmem:[#allocation5 + $0x484] ss:$16 sps:$4 sm:$0xff]   ;;  %v4179_v21 = vld [vmem:[#allocation5 + $0x480] ss:$16 sps:$4 sm:$0xff]  }
  0x9d   : > { %1808 = vmatprep.subr.bf16.mxu1 %v4123_v41  ;;  %v4184_v20 = vld [vmem:[#allocation5 + $0x684] ss:$16 sps:$4 sm:$0xff]   ;;  %v4182_v22 = vld [vmem:[#allocation5 + $0x680] ss:$16 sps:$4 sm:$0xff]  }
  0x9e   : > { %v4187_v23 = vld [vmem:[#allocation5 + $0x464] ss:$16 sps:$4 sm:$0xff]   ;;  %v4185_v25 = vld [vmem:[#allocation5 + $0x460] ss:$16 sps:$4 sm:$0xff]  }
  0x9f   : > { %1768 = vmatpush2.bf16.msra.mxu0 %v4125_v42  ;;  %v4190_v24 = vld [vmem:[#allocation5 + $0x664] ss:$16 sps:$4 sm:$0xff]   ;;  %v4188_v26 = vld [vmem:[#allocation5 + $0x660] ss:$16 sps:$4 sm:$0xff]   ;;  %v4215_v42 = vld [vmem:[#allocation5 + $0xec] ss:$16 sps:$4 sm:$0xff]  }
  0xa0   : > { %1809 = vmatpush2.bf16.msra.mxu1 %v4126_v43  ;;  %1769 = vmatprep.subr.bf16.mxu0 %v4127_v44  ;;  %v4193_v27 = vld [vmem:[#allocation5 + $0x444] ss:$16 sps:$4 sm:$0xff]   ;;  %v4191_v29 = vld [vmem:[#allocation5 + $0x440] ss:$16 sps:$4 sm:$0xff]  }
  0xa1   : > { %1810 = vmatprep.subr.bf16.mxu1 %v4129_v45  ;;  %v4196_v28 = vld [vmem:[#allocation5 + $0x644] ss:$16 sps:$4 sm:$0xff]   ;;  %v4194_v30 = vld [vmem:[#allocation5 + $0x640] ss:$16 sps:$4 sm:$0xff]   ;;  %v4213_v45 = vld [vmem:[#allocation5 + $0xe8] ss:$16 sps:$4 sm:$0xff]  }
  0xa2   : > { %v4199_v31 = vld [vmem:[#allocation5 + $0x424] ss:$16 sps:$4 sm:$0xff]   ;;  %v4197_v34 = vld [vmem:[#allocation5 + $0x420] ss:$16 sps:$4 sm:$0xff]  }
  0xa3   : > { %1770 = vmatpush2.bf16.msra.mxu0 %v4131_v49  ;;  %v4202_v32 = vld [vmem:[#allocation5 + $0x624] ss:$16 sps:$4 sm:$0xff]   ;;  %v4200_v36 = vld [vmem:[#allocation5 + $0x620] ss:$16 sps:$4 sm:$0xff]  }
  0xa4   : > { %1811 = vmatpush2.bf16.msra.mxu1 %v4132_v50  ;;  %1771 = vmatprep.subr.bf16.mxu0 %v4133_v52  ;;  %v5066_v33 = vld [vmem:[%s5036_s10 + $0x10] sm:$0xff]  ;;  %v4203_v39 = vld [vmem:[#allocation5 + $0x400] ss:$16 sps:$4 sm:$0xff]  }
  0xa5   : > { %1812 = vmatprep.subr.bf16.mxu1 %v4135_v53  ;;  %v5070_v35 = vcombine.high %v5066_v33, %v5066_v33  ;;  %v4205_v37 = vld [vmem:[#allocation5 + $0x404] ss:$16 sps:$4 sm:$0xff]   ;;  %v4206_v40 = vld [vmem:[#allocation5 + $0x600] ss:$16 sps:$4 sm:$0xff]   ;;  %v4219_v50 = vld [vmem:[#allocation5 + $0xc8] ss:$16 sps:$4 sm:$0xff]  }
  0xa6   : > { %v4208_v38 = vld [vmem:[#allocation5 + $0x604] ss:$16 sps:$4 sm:$0xff]   ;;  %v4209_v43 = vld [vmem:[#allocation5 + $0x5e0] ss:$16 sps:$4 sm:$0xff]   ;;  %v4227_v53 = vld [vmem:[#allocation5 + $0xac] ss:$16 sps:$4 sm:$0xff]  }
  0xa7   : > { %1772 = vmatpush2.bf16.msra.mxu0 %v4137_v54  ;;  %v4211_v41 = vld [vmem:[#allocation5 + $0x5e4] ss:$16 sps:$4 sm:$0xff]   ;;  %v4212_v44 = vld [vmem:[%s5036_s10 + $0x18] ss:$0 sps:$4 sm:$0xff]  }
  0xa8   : > { %1813 = vmatpush2.bf16.msra.mxu1 %v4138_v55  ;;  %1773 = vmatprep.subr.bf16.mxu0 %v4139_v56  ;;  %v4218_v46 = vld [vmem:[#allocation5 + $0x5c4] ss:$16 sps:$4 sm:$0xff]   ;;  %v4216_v49 = vld [vmem:[#allocation5 + $0x5c0] ss:$16 sps:$4 sm:$0xff]   ;;  %v4225_v55 = vld [vmem:[#allocation5 + $0xa8] ss:$16 sps:$4 sm:$0xff]  }
  0xa9   : > { %1814 = vmatprep.subr.bf16.mxu1 %v4141_v57  ;;  %v4224_v52 = vld [vmem:[#allocation5 + $0x5a4] ss:$16 sps:$4 sm:$0xff]   ;;  %v4222_v54 = vld [vmem:[#allocation5 + $0x5a0] ss:$16 sps:$4 sm:$0xff]   ;;  %v4233_v57 = vld [vmem:[#allocation5 + $0x8c] ss:$16 sps:$4 sm:$0xff]  }
  0xaa   : > { %v4230_v56 = vld [vmem:[#allocation5 + $0x584] ss:$16 sps:$4 sm:$0xff]  }
  0xab   : > { %1774 = vmatpush2.bf16.msra.mxu0 %v4143_v58  ;;  %v4228_v58 = vld [vmem:[#allocation5 + $0x580] ss:$16 sps:$4 sm:$0xff]  }
  0xac   : > { %1815 = vmatpush2.bf16.msra.mxu1 %v4144_v59  ;;  %1775 = vmatprep.subr.bf16.mxu0 %v4145_v60  ;;  %v4231_v59 = vld [vmem:[#allocation5 + $0x88] ss:$16 sps:$4 sm:$0xff]   ;;  %v4236_v60 = vld [vmem:[#allocation5 + $0x564] ss:$16 sps:$4 sm:$0xff]  }
  0xad   : > { %1816 = vmatprep.subr.bf16.mxu1 %v4147_v61  ;;  %v4239_v61 = vld [vmem:[#allocation5 + $0x6c] ss:$16 sps:$4 sm:$0xff]  }
  0xaf   : > { %1776 = vmatpush2.bf16.msra.mxu0 %v4149_v62  ;;  %v4234_v62 = vld [vmem:[#allocation5 + $0x560] ss:$16 sps:$4 sm:$0xff]  }
  0xb0   : > { %1817 = vmatpush2.bf16.msra.mxu1 %v4150_v63  ;;  %1777 = vmatprep.subr.bf16.mxu0 %v4151_v0  ;;  %v4242_v63 = vld [vmem:[#allocation5 + $0x544] ss:$16 sps:$4 sm:$0xff]   ;;  %v4245_v0 = vld [vmem:[#allocation5 + $0x4c] ss:$16 sps:$4 sm:$0xff]  }
  0xb1   : > { %1818 = vmatprep.subr.bf16.mxu1 %v4153_v1  ;;  %v4240_v1 = vld [vmem:[#allocation5 + $0x540] ss:$16 sps:$4 sm:$0xff]  }
  0xb3   : > { %1778 = vmatpush2.bf16.msra.mxu0 %v4155_v2  ;;  %v4243_v2 = vld [vmem:[#allocation5 + $0x48] ss:$16 sps:$4 sm:$0xff]  }
  0xb4   : > { %1819 = vmatpush2.bf16.msra.mxu1 %v4156_v3  ;;  %1829 = vmatprep.subr.bf16.mxu0 %v4163_v4  ;;  %v4248_v3 = vld [vmem:[#allocation5 + $0x524] ss:$16 sps:$4 sm:$0xff]   ;;  %v4251_v4 = vld [vmem:[#allocation5 + $0x2c] ss:$16 sps:$4 sm:$0xff]  }
  0xb5   : > { %1870 = vmatprep.subr.bf16.mxu1 %v4166_v5  ;;  %v4246_v5 = vld [vmem:[#allocation5 + $0x520] ss:$16 sps:$4 sm:$0xff]  }
  0xb6   : > { %1780 = vmatmul.mubr.bf16.vlgmr.msra.gmra.mxu0 %v5058_v6 }
  0xb7   : > { %1821 = vmatmul.mubr.bf16.vlgmr.msra.gmra.mxu1 %v5060_v7  ;;  %1830 = vmatpush1.bf16.msra.mxu0 %v4161_v8  ;;  %v4249_v8 = vld [vmem:[#allocation5 + $0x28] ss:$16 sps:$4 sm:$0xff]  }
  0xb8   : > { %1871 = vmatpush1.bf16.msra.mxu1 %v4164_v9  ;;  %1831 = vmatprep.subr.bf16.mxu0 %v4169_v10  ;;  %v4254_v9 = vld [vmem:[#allocation5 + $0x504] ss:$16 sps:$4 sm:$0xff]   ;;  %v4257_v10 = vld [vmem:[#allocation5 + $0xc] ss:$16 sps:$4 sm:$0xff]  }
  0xb9   : > { %1872 = vmatprep.subr.bf16.mxu1 %v4172_v11  ;;  %1902 = vmatprep.mubr.bf16.mxu1 %v4844_v16  ;;  %v4252_v11 = vld [vmem:[#allocation5 + $0x500] ss:$16 sps:$4 sm:$0xff]  }
  0xba   : > { %1861 = vmatprep.mubr.bf16.mxu0 %v5070_v35 }
  0xbb   : > { %1832 = vmatpush1.bf16.msra.mxu0 %v4167_v12  ;;  %v4255_v12 = vld [vmem:[#allocation5 + $0x8] ss:$16 sps:$4 sm:$0xff]  }
  0xbc   : > { %1873 = vmatpush1.bf16.msra.mxu1 %v4170_v13  ;;  %1833 = vmatprep.subr.bf16.mxu0 %v4175_v14  ;;  %v4262_v13 = vld [vmem:[#allocation5 + $0x1ec] ss:$16 sps:$4 sm:$0xff]  }
  0xbd   : > { %1874 = vmatprep.subr.bf16.mxu1 %v4178_v15  ;;  %v4265_v14 = vld [vmem:[#allocation5 + $0x2ec] ss:$16 sps:$4 sm:$0xff]   ;;  %v5077_v15 = vcombine.low %v5066_v33, %v5066_v33  ;;  %v4284_v33 = vld [vmem:[#allocation5 + $0x168] ss:$16 sps:$4 sm:$0xff]  }
  0xbf   : > { %1834 = vmatpush1.bf16.msra.mxu0 %v4173_v17  ;;  %v4260_v17 = vld [vmem:[#allocation5 + $0x1e8] ss:$16 sps:$4 sm:$0xff]  }
  0xc0   : > { %1875 = vmatpush1.bf16.msra.mxu1 %v4176_v18  ;;  %1835 = vmatprep.subr.bf16.mxu0 %v4181_v19  ;;  %v4263_v18 = vld [vmem:[#allocation5 + $0x2e8] ss:$16 sps:$4 sm:$0xff]   ;;  %v4268_v19 = vld [vmem:[#allocation5 + $0x1cc] ss:$16 sps:$4 sm:$0xff]  }
  0xc1   : > { %1876 = vmatprep.subr.bf16.mxu1 %v4184_v20  ;;  %v4271_v20 = vld [vmem:[#allocation5 + $0x2cc] ss:$16 sps:$4 sm:$0xff]  }
  0xc3   : > { %1836 = vmatpush1.bf16.msra.mxu0 %v4179_v21  ;;  %v4266_v21 = vld [vmem:[#allocation5 + $0x1c8] ss:$16 sps:$4 sm:$0xff]  }
  0xc4   : > { %1877 = vmatpush1.bf16.msra.mxu1 %v4182_v22  ;;  %1837 = vmatprep.subr.bf16.mxu0 %v4187_v23  ;;  %v4269_v22 = vld [vmem:[#allocation5 + $0x2c8] ss:$16 sps:$4 sm:$0xff]   ;;  %v4274_v23 = vld [vmem:[#allocation5 + $0x1ac] ss:$16 sps:$4 sm:$0xff]  }
  0xc5   : > { %1878 = vmatprep.subr.bf16.mxu1 %v4190_v24  ;;  %v4277_v24 = vld [vmem:[#allocation5 + $0x2ac] ss:$16 sps:$4 sm:$0xff]  }
  0xc7   : > { %1838 = vmatpush1.bf16.msra.mxu0 %v4185_v25  ;;  %v4272_v25 = vld [vmem:[#allocation5 + $0x1a8] ss:$16 sps:$4 sm:$0xff]  }
  0xc8   : > { %1879 = vmatpush1.bf16.msra.mxu1 %v4188_v26  ;;  %1839 = vmatprep.subr.bf16.mxu0 %v4193_v27  ;;  %v4275_v26 = vld [vmem:[#allocation5 + $0x2a8] ss:$16 sps:$4 sm:$0xff]   ;;  %v4280_v27 = vld [vmem:[#allocation5 + $0x18c] ss:$16 sps:$4 sm:$0xff]  }
  0xc9   : > { %1880 = vmatprep.subr.bf16.mxu1 %v4196_v28  ;;  %v4283_v28 = vld [vmem:[#allocation5 + $0x28c] ss:$16 sps:$4 sm:$0xff]  }
  0xcb   : > { %1840 = vmatpush1.bf16.msra.mxu0 %v4191_v29  ;;  %v4278_v29 = vld [vmem:[#allocation5 + $0x188] ss:$16 sps:$4 sm:$0xff]  }
  0xcc   : > { %1881 = vmatpush1.bf16.msra.mxu1 %v4194_v30  ;;  %1841 = vmatprep.subr.bf16.mxu0 %v4199_v31  ;;  %v4281_v30 = vld [vmem:[#allocation5 + $0x288] ss:$16 sps:$4 sm:$0xff]   ;;  %v4286_v31 = vld [vmem:[#allocation5 + $0x16c] ss:$16 sps:$4 sm:$0xff]  }
  0xcd   : > { %1882 = vmatprep.subr.bf16.mxu1 %v4202_v32  ;;  %v4289_v32 = vld [vmem:[#allocation5 + $0x26c] ss:$16 sps:$4 sm:$0xff]  }
  0xcf   : > { %1842 = vmatpush1.bf16.msra.mxu0 %v4197_v34  ;;  %v4292_v34 = vld [vmem:[#allocation5 + $0x14c] ss:$16 sps:$4 sm:$0xff]  }
  0xd0   : > { %1883 = vmatpush1.bf16.msra.mxu1 %v4200_v36  ;;  %1843 = vmatprep.subr.bf16.mxu0 %v4205_v37  ;;  %v4295_v36 = vld [vmem:[#allocation5 + $0x24c] ss:$16 sps:$4 sm:$0xff]   ;;  %v4290_v37 = vld [vmem:[#allocation5 + $0x148] ss:$16 sps:$4 sm:$0xff]  }
  0xd1   : > { %1884 = vmatprep.subr.bf16.mxu1 %v4208_v38  ;;  %v4293_v38 = vld [vmem:[#allocation5 + $0x248] ss:$16 sps:$4 sm:$0xff]  }
  0xd3   : > { %1844 = vmatpush1.bf16.msra.mxu0 %v4203_v39  ;;  %v4298_v39 = vld [vmem:[#allocation5 + $0x12c] ss:$16 sps:$4 sm:$0xff]  }
  0xd4   : > { %1885 = vmatpush1.bf16.msra.mxu1 %v4206_v40  ;;  %1845 = vmatprep.subr.bf16.mxu0 %v4211_v41  ;;  %v4301_v40 = vld [vmem:[#allocation5 + $0x22c] ss:$16 sps:$4 sm:$0xff]   ;;  %v4296_v41 = vld [vmem:[#allocation5 + $0x128] ss:$16 sps:$4 sm:$0xff]  }
  0xd5   : > { %1911 = vmatprep.subr.bf16.mxu1 %v4215_v42  ;;  %v4299_v42 = vld [vmem:[#allocation5 + $0x228] ss:$16 sps:$4 sm:$0xff]  }
  0xd7   : > { %1903 = vmatmul.mubr.bf16.vlgmr.msra.gmra.mxu1 %v4212_v44  ;;  %1846 = vmatpush2.bf16.msra.mxu0 %v4209_v43  ;;  %v4304_v43 = vld [vmem:[#allocation5 + $0x10c] ss:$16 sps:$4 sm:$0xff]  }
  0xd8   : > { %1912 = vmatpush1.bf16.msra.mxu1 %v4213_v45  ;;  %1847 = vmatprep.subr.bf16.mxu0 %v4218_v46  ;;  %v4307_v44 = vld [vmem:[#allocation5 + $0x20c] ss:$16 sps:$4 sm:$0xff]   ;;  %v4302_v45 = vld [vmem:[#allocation5 + $0x108] ss:$16 sps:$4 sm:$0xff]  }
  0xd9   : > { %1913 = vmatprep.subr.bf16.mxu1 %v4221_v48  ;;  %1943 = vmatprep.mubr.bf16.mxu1 %v5051_v47  ;;  %v4237_v47 = vld [vmem:[#allocation5 + $0x68] ss:$16 sps:$4 sm:$0xff]   ;;  %v4310_v48 = vld [vmem:[#allocation5 + $0x3ec] ss:$16 sps:$4 sm:$0xff]  }
  0xda   : > { %v4305_v46 = vld [vmem:[#allocation5 + $0x208] ss:$16 sps:$4 sm:$0xff]  }
  0xdb   : > { %1848 = vmatpush2.bf16.msra.mxu0 %v4216_v49  ;;  %v4313_v49 = vld [vmem:[#allocation5 + $0x4ec] ss:$16 sps:$4 sm:$0xff]  }
  0xdc   : > { %1914 = vmatpush1.bf16.msra.mxu1 %v4219_v50  ;;  %1849 = vmatprep.subr.bf16.mxu0 %v4224_v52  ;;  %v4308_v50 = vld [vmem:[#allocation5 + $0x3e8] ss:$16 sps:$4 sm:$0xff]  }
  0xdd   : > { %1915 = vmatprep.subr.bf16.mxu1 %v4227_v53  ;;  %v4311_v52 = vld [vmem:[#allocation5 + $0x4e8] ss:$16 sps:$4 sm:$0xff]   ;;  %v4316_v53 = vld [vmem:[#allocation5 + $0x3cc] ss:$16 sps:$4 sm:$0xff]  }
  0xdf   : > { %1850 = vmatpush2.bf16.msra.mxu0 %v4222_v54  ;;  %v4319_v54 = vld [vmem:[#allocation5 + $0x4cc] ss:$16 sps:$4 sm:$0xff]  }
  0xe0   : > { %1916 = vmatpush1.bf16.msra.mxu1 %v4225_v55  ;;  %1851 = vmatprep.subr.bf16.mxu0 %v4230_v56  ;;  %v4314_v55 = vld [vmem:[#allocation5 + $0x3c8] ss:$16 sps:$4 sm:$0xff]  }
  0xe1   : > { %1917 = vmatprep.subr.bf16.mxu1 %v4233_v57  ;;  %v4317_v56 = vld [vmem:[#allocation5 + $0x4c8] ss:$16 sps:$4 sm:$0xff]   ;;  %v4322_v57 = vld [vmem:[#allocation5 + $0x3ac] ss:$16 sps:$4 sm:$0xff]  }
  0xe3   : > { %1852 = vmatpush2.bf16.msra.mxu0 %v4228_v58  ;;  %v4325_v58 = vld [vmem:[#allocation5 + $0x4ac] ss:$16 sps:$4 sm:$0xff]  }
  0xe4   : > { %1918 = vmatpush1.bf16.msra.mxu1 %v4231_v59  ;;  %1853 = vmatprep.subr.bf16.mxu0 %v4236_v60  ;;  %v4320_v59 = vld [vmem:[#allocation5 + $0x3a8] ss:$16 sps:$4 sm:$0xff]  }
  0xe5   : > { %1919 = vmatprep.subr.bf16.mxu1 %v4239_v61  ;;  %v4323_v60 = vld [vmem:[#allocation5 + $0x4a8] ss:$16 sps:$4 sm:$0xff]   ;;  %v4328_v61 = vld [vmem:[#allocation5 + $0x38c] ss:$16 sps:$4 sm:$0xff]  }
  0xe7   : > { %1854 = vmatpush2.bf16.msra.mxu0 %v4234_v62  ;;  %v4331_v62 = vld [vmem:[#allocation5 + $0x48c] ss:$16 sps:$4 sm:$0xff]  }
  0xe8   : > { %1920 = vmatpush1.bf16.msra.mxu1 %v4237_v47  ;;  %1855 = vmatprep.subr.bf16.mxu0 %v4242_v63  ;;  %v4326_v47 = vld [vmem:[#allocation5 + $0x388] ss:$16 sps:$4 sm:$0xff]   ;;  %v4334_v63 = vld [vmem:[#allocation5 + $0x36c] ss:$16 sps:$4 sm:$0xff]  }
  0xe9   : > { %1921 = vmatprep.subr.bf16.mxu1 %v4245_v0  ;;  %v4337_v0 = vld [vmem:[#allocation5 + $0x46c] ss:$16 sps:$4 sm:$0xff]  }
  0xeb   : > { %1856 = vmatpush2.bf16.msra.mxu0 %v4240_v1  ;;  %v4332_v1 = vld [vmem:[#allocation5 + $0x368] ss:$16 sps:$4 sm:$0xff]  }
  0xec   : > { %1922 = vmatpush1.bf16.msra.mxu1 %v4243_v2  ;;  %1857 = vmatprep.subr.bf16.mxu0 %v4248_v3  ;;  %v4335_v2 = vld [vmem:[#allocation5 + $0x468] ss:$16 sps:$4 sm:$0xff]   ;;  %v4340_v3 = vld [vmem:[#allocation5 + $0x34c] ss:$16 sps:$4 sm:$0xff]  }
  0xed   : > { %1923 = vmatprep.subr.bf16.mxu1 %v4251_v4  ;;  %v4343_v4 = vld [vmem:[#allocation5 + $0x44c] ss:$16 sps:$4 sm:$0xff]  }
  0xef   : > { %1858 = vmatpush2.bf16.msra.mxu0 %v4246_v5  ;;  %v4341_v5 = vld [vmem:[#allocation5 + $0x448] ss:$16 sps:$4 sm:$0xff]  }
  0xf0   : > { %1924 = vmatpush1.bf16.msra.mxu1 %v4249_v8  ;;  %1859 = vmatprep.subr.bf16.mxu0 %v4254_v9  ;;  %v4346_v8 = vld [vmem:[#allocation5 + $0x32c] ss:$16 sps:$4 sm:$0xff]  }
  0xf1   : > { %1925 = vmatprep.subr.bf16.mxu1 %v4257_v10  ;;  %v4349_v9 = vld [vmem:[#allocation5 + $0x42c] ss:$16 sps:$4 sm:$0xff]   ;;  %v4344_v10 = vld [vmem:[#allocation5 + $0x328] ss:$16 sps:$4 sm:$0xff]  }
  0xf3   : > { %1860 = vmatpush2.bf16.msra.mxu0 %v4252_v11  ;;  %v4347_v11 = vld [vmem:[#allocation5 + $0x428] ss:$16 sps:$4 sm:$0xff]  }
  0xf4   : > { %1926 = vmatpush1.bf16.msra.mxu1 %v4255_v12  ;;  %1952 = vmatprep.subr.bf16.mxu0 %v4265_v14  ;;  %v4352_v12 = vld [vmem:[#allocation5 + $0x30c] ss:$16 sps:$4 sm:$0xff]   ;;  %v4350_v14 = vld [vmem:[#allocation5 + $0x308] ss:$16 sps:$4 sm:$0xff]  }
  0xf5   : > { %1927 = vmatprep.subr.bf16.mxu1 %v4262_v13  ;;  %v4355_v13 = vld [vmem:[#allocation5 + $0x40c] ss:$16 sps:$4 sm:$0xff]  }
  0xf6   : > { %1862 = vmatmul.mubr.bf16.vlgmr.msra.gmra.mxu0 %v5077_v15 }
  0xf7   : > { %1953 = vmatpush1.bf16.msra.mxu0 %v4263_v18  ;;  %1984 = vmatprep.mubr.bf16.mxu0 %v5054_v51  ;;  %v4287_v51 = vld [vmem:[#allocation5 + $0x268] ss:$16 sps:$4 sm:$0xff]   ;;  %v4358_v18 = vld [vmem:[#allocation5 + $0x5ec] ss:$16 sps:$4 sm:$0xff]  }
  0xf8   : > { %1928 = vmatpush2.bf16.msra.mxu1 %v4260_v17  ;;  %1954 = vmatprep.subr.bf16.mxu0 %v4271_v20  ;;  %v4353_v17 = vld [vmem:[#allocation5 + $0x408] ss:$16 sps:$4 sm:$0xff]  }
  0xf9   : > { %1929 = vmatprep.subr.bf16.mxu1 %v4268_v19  ;;  %v4361_v19 = vld [vmem:[#allocation5 + $0x6ec] ss:$16 sps:$4 sm:$0xff]   ;;  %v4356_v20 = vld [vmem:[#allocation5 + $0x5e8] ss:$16 sps:$4 sm:$0xff]  }
  0xfb   : > { %1955 = vmatpush1.bf16.msra.mxu0 %v4269_v22  ;;  %v4364_v22 = vld [vmem:[#allocation5 + $0x5cc] ss:$16 sps:$4 sm:$0xff]  }
  0xfc   : > { %1930 = vmatpush2.bf16.msra.mxu1 %v4266_v21  ;;  %1956 = vmatprep.subr.bf16.mxu0 %v4277_v24  ;;  %v4359_v21 = vld [vmem:[#allocation5 + $0x6e8] ss:$16 sps:$4 sm:$0xff]  }
  0xfd   : > { %1931 = vmatprep.subr.bf16.mxu1 %v4274_v23  ;;  %v4367_v23 = vld [vmem:[#allocation5 + $0x6cc] ss:$16 sps:$4 sm:$0xff]   ;;  %v4362_v24 = vld [vmem:[#allocation5 + $0x5c8] ss:$16 sps:$4 sm:$0xff]  }
  0xff   : > { %1957 = vmatpush1.bf16.msra.mxu0 %v4275_v26  ;;  %v4370_v26 = vld [vmem:[#allocation5 + $0x5ac] ss:$16 sps:$4 sm:$0xff]  }
 0x100   : > { %1932 = vmatpush2.bf16.msra.mxu1 %v4272_v25  ;;  %1958 = vmatprep.subr.bf16.mxu0 %v4283_v28  ;;  %v4365_v25 = vld [vmem:[#allocation5 + $0x6c8] ss:$16 sps:$4 sm:$0xff]  }
 0x101   : > { %1933 = vmatprep.subr.bf16.mxu1 %v4280_v27  ;;  %v4373_v27 = vld [vmem:[#allocation5 + $0x6ac] ss:$16 sps:$4 sm:$0xff]   ;;  %v4368_v28 = vld [vmem:[#allocation5 + $0x5a8] ss:$16 sps:$4 sm:$0xff]  }
 0x103   : > { %1959 = vmatpush1.bf16.msra.mxu0 %v4281_v30  ;;  %v4376_v30 = vld [vmem:[#allocation5 + $0x58c] ss:$16 sps:$4 sm:$0xff]  }
 0x104   : > { %1934 = vmatpush2.bf16.msra.mxu1 %v4278_v29  ;;  %1960 = vmatprep.subr.bf16.mxu0 %v4289_v32  ;;  %v4371_v29 = vld [vmem:[#allocation5 + $0x6a8] ss:$16 sps:$4 sm:$0xff]  }
 0x105   : > { %1935 = vmatprep.subr.bf16.mxu1 %v4286_v31  ;;  %v4379_v31 = vld [vmem:[#allocation5 + $0x68c] ss:$16 sps:$4 sm:$0xff]   ;;  %v4374_v32 = vld [vmem:[#allocation5 + $0x588] ss:$16 sps:$4 sm:$0xff]  }
 0x107   : > { %1961 = vmatpush1.bf16.msra.mxu0 %v4287_v51  ;;  %v4385_v51 = vld [vmem:[#allocation5 + $0x66c] ss:$16 sps:$4 sm:$0xff]  }
 0x108   : > { %1936 = vmatpush2.bf16.msra.mxu1 %v4284_v33  ;;  %1962 = vmatprep.subr.bf16.mxu0 %v4295_v36  ;;  %v4377_v33 = vld [vmem:[#allocation5 + $0x688] ss:$16 sps:$4 sm:$0xff]  }
 0x109   : > { %1937 = vmatprep.subr.bf16.mxu1 %v4292_v34  ;;  %v4380_v34 = vld [vmem:[#allocation5 + $0x568] ss:$16 sps:$4 sm:$0xff]  }
 0x10a   : > { %v4383_v36 = vld [vmem:[#allocation5 + $0x668] ss:$16 sps:$4 sm:$0xff]  }
 0x10b   : > { %1963 = vmatpush1.bf16.msra.mxu0 %v4293_v38  ;;  %v4386_v38 = vld [vmem:[#allocation5 + $0x548] ss:$16 sps:$4 sm:$0xff]  }
 0x10c   : > { %1938 = vmatpush2.bf16.msra.mxu1 %v4290_v37  ;;  %1964 = vmatprep.subr.bf16.mxu0 %v4301_v40  ;;  %v4388_v37 = vld [vmem:[#allocation5 + $0x54c] ss:$16 sps:$4 sm:$0xff]  }
 0x10d   : > { %1939 = vmatprep.subr.bf16.mxu1 %v4298_v39  ;;  %v4389_v39 = vld [vmem:[#allocation5 + $0x648] ss:$16 sps:$4 sm:$0xff]   ;;  %v4394_v40 = vld [vmem:[#allocation5 + $0x52c] ss:$16 sps:$4 sm:$0xff]  }
 0x10f   : > { %1965 = vmatpush1.bf16.msra.mxu0 %v4299_v42  ;;  %v4392_v42 = vld [vmem:[#allocation5 + $0x528] ss:$16 sps:$4 sm:$0xff]  }
 0x110   : > { %1940 = vmatpush2.bf16.msra.mxu1 %v4296_v41  ;;  %1966 = vmatprep.subr.bf16.mxu0 %v4307_v44  ;;  %v4397_v41 = vld [vmem:[#allocation5 + $0x62c] ss:$16 sps:$4 sm:$0xff]  }
 0x111   : > { %1941 = vmatprep.subr.bf16.mxu1 %v4304_v43  ;;  %v4395_v43 = vld [vmem:[#allocation5 + $0x628] ss:$16 sps:$4 sm:$0xff]   ;;  %v4400_v44 = vld [vmem:[#allocation5 + $0x50c] ss:$16 sps:$4 sm:$0xff]  }
 0x113   : > { %1967 = vmatpush1.bf16.msra.mxu0 %v4305_v46  ;;  %v4398_v46 = vld [vmem:[#allocation5 + $0x508] ss:$16 sps:$4 sm:$0xff]  }
 0x114   : > { %1942 = vmatpush2.bf16.msra.mxu1 %v4302_v45  ;;  %1968 = vmatprep.subr.bf16.mxu0 %v4310_v48  ;;  %v4403_v45 = vld [vmem:[#allocation5 + $0x60c] ss:$16 sps:$4 sm:$0xff]   ;;  %v4401_v48 = vld [vmem:[#allocation5 + $0x608] ss:$16 sps:$4 sm:$0xff]  }
 0x115   : > { %1993 = vmatprep.subr.bf16.mxu1 %v4313_v49  ;;  %v4406_v49 = vld [vmem:[#allocation8 + $0xe4] ss:$16 sps:$4 sm:$0xff]  }
 0x117   : > { %1944 = vmatmul.mubr.bf16.vlgmr.msra.gmra.mxu1 %v5058_v6  ;;  %1969 = vmatpush2.bf16.msra.mxu0 %v4308_v50  ;;  %v4329_v6 = vld [vmem:[#allocation5 + $0x488] ss:$16 sps:$4 sm:$0xff]   ;;  %v4404_v50 = vld [vmem:[#allocation8 + $0xe0] ss:$16 sps:$4 sm:$0xff]  }
 0x118   : > { %1994 = vmatpush1.bf16.msra.mxu1 %v4311_v52  ;;  %1970 = vmatprep.subr.bf16.mxu0 %v4316_v53  ;;  %v4409_v52 = vld [vmem:[#allocation8 + $0xc4] ss:$16 sps:$4 sm:$0xff]   ;;  %v4628_v53 = vld [vmem:[%s5036_s10 + $0x18] ss:$0 sps:$4 sm:$0xff]   ;;  %s4765_s10 = sshll.u32 %s4845_s19, 4  ;;  %s4766_s10 = int_to_ptr.vmem [resolvable:$false] %s4765_s10 }
 0x119   : > { %1995 = vmatprep.subr.bf16.mxu1 %v4319_v54  ;;  %2025 = vmatprep.mubr.bf16.mxu1 %v5070_v35  ;;  %v4338_v35 = vld [vmem:[#allocation5 + $0x348] ss:$16 sps:$4 sm:$0xff]   ;;  %v4407_v54 = vld [vmem:[#allocation8 + $0xc0] ss:$16 sps:$4 sm:$0xff]   ;;  %s4767_s30 = scalar_lea.vmem %s4766_s10, 256  ;;  %p4768_p0 = scmp.lt.s32.totalorder %s3405_s12, %s4766_s10 }
 0x11a   : > { %p4769_p2 = scmp.lt.s32.totalorder %s4767_s30, %s4761_s18 }
 0x11b   : > { %1971 = vmatpush2.bf16.msra.mxu0 %v4314_v55  ;;  %v4412_v55 = vld [vmem:[#allocation8 + $0xa4] ss:$16 sps:$4 sm:$0xff]  }
 0x11c   : > { %1996 = vmatpush1.bf16.msra.mxu1 %v4317_v56  ;;  %1972 = vmatprep.subr.bf16.mxu0 %v4322_v57  ;;  %v4410_v56 = vld [vmem:[#allocation8 + $0xa0] ss:$16 sps:$4 sm:$0xff]   ;;  %v4415_v57 = vld [vmem:[#allocation8 + $0x84] ss:$16 sps:$4 sm:$0xff]   ;;  %p4770_p9 = por %p4769_p2, %p4768_p0 }
 0x11d   : > { %1997 = vmatprep.subr.bf16.mxu1 %v4325_v58  ;;  %v4413_v58 = vld [vmem:[#allocation8 + $0x80] ss:$16 sps:$4 sm:$0xff]  }
 0x11e   : > { %p4771_p11 = pnand %p4770_p9, %p4764_p6 }
 0x11f   : > { %1973 = vmatpush2.bf16.msra.mxu0 %v4320_v59  ;;  %v4476_v59 = vld [vmem:[#allocation8 + $0x2e0] ss:$16 sps:$4 sm:$0xff]  }
 0x120   : > { %1998 = vmatpush1.bf16.msra.mxu1 %v4323_v60  ;;  %1974 = vmatprep.subr.bf16.mxu0 %v4328_v61  ;;  %v4478_v60 = vld [vmem:[#allocation8 + $0x2e4] ss:$16 sps:$4 sm:$0xff]  }
 0x121   : > { %1999 = vmatprep.subr.bf16.mxu1 %v4331_v62  ;;  %v4418_v61 = vld [vmem:[#allocation8 + $0x64] ss:$16 sps:$4 sm:$0xff]   ;;  %v4482_v62 = vld [vmem:[#allocation8 + $0x2c0] ss:$16 sps:$4 sm:$0xff]  }
 0x123   : > { %1975 = vmatpush2.bf16.msra.mxu0 %v4326_v47  ;;  %v4484_v47 = vld [vmem:[#allocation8 + $0x2c4] ss:$16 sps:$4 sm:$0xff]  }
 0x124   : > { %2000 = vmatpush1.bf16.msra.mxu1 %v4329_v6  ;;  %1976 = vmatprep.subr.bf16.mxu0 %v4334_v63  ;;  %v4421_v6 = vld [vmem:[#allocation8 + $0x44] ss:$16 sps:$4 sm:$0xff]   ;;  %v4419_v63 = vld [vmem:[#allocation8 + $0x40] ss:$16 sps:$4 sm:$0xff]  }
 0x125   : > { %2001 = vmatprep.subr.bf16.mxu1 %v4337_v0  ;;  %v4488_v0 = vld [vmem:[#allocation8 + $0x2a0] ss:$16 sps:$4 sm:$0xff]  }
 0x127   : > { %1977 = vmatpush2.bf16.msra.mxu0 %v4332_v1  ;;  %v4490_v1 = vld [vmem:[#allocation8 + $0x2a4] ss:$16 sps:$4 sm:$0xff]  }
 0x128   : > { %2002 = vmatpush1.bf16.msra.mxu1 %v4335_v2  ;;  %1978 = vmatprep.subr.bf16.mxu0 %v4340_v3  ;;  %v4424_v2 = vld [vmem:[#allocation8 + $0x24] ss:$16 sps:$4 sm:$0xff]   ;;  %v4422_v3 = vld [vmem:[#allocation8 + $0x20] ss:$16 sps:$4 sm:$0xff]  }
 0x129   : > { %2003 = vmatprep.subr.bf16.mxu1 %v4343_v4  ;;  %v4494_v4 = vld [vmem:[#allocation8 + $0x280] ss:$16 sps:$4 sm:$0xff]  }
 0x12b   : > { %1979 = vmatpush2.bf16.msra.mxu0 %v4338_v35  ;;  %v4496_v35 = vld [vmem:[#allocation8 + $0x284] ss:$16 sps:$4 sm:$0xff]  }
 0x12c   : > { %2004 = vmatpush1.bf16.msra.mxu1 %v4341_v5  ;;  %1980 = vmatprep.subr.bf16.mxu0 %v4346_v8  ;;  %v4427_v5 = vld [vmem:[#allocation8 + $0x4] ss:$16 sps:$4 sm:$0xff]   ;;  %v4425_v8 = vld [vmem:[#allocation8] ss:$16 sps:$4 sm:$0xff]  }
 0x12d   : > { %2005 = vmatprep.subr.bf16.mxu1 %v4349_v9  ;;  %v4500_v9 = vld [vmem:[#allocation8 + $0x260] ss:$16 sps:$4 sm:$0xff]  }
 0x12f   : > { %1981 = vmatpush2.bf16.msra.mxu0 %v4344_v10  ;;  %v4502_v10 = vld [vmem:[#allocation8 + $0x264] ss:$16 sps:$4 sm:$0xff]  }
 0x130   : > { %2006 = vmatpush1.bf16.msra.mxu1 %v4347_v11  ;;  %1982 = vmatprep.subr.bf16.mxu0 %v4352_v12  ;;  %v4430_v11 = vld [vmem:[#allocation8 + $0x1e4] ss:$16 sps:$4 sm:$0xff]   ;;  %v4428_v12 = vld [vmem:[#allocation8 + $0x1e0] ss:$16 sps:$4 sm:$0xff]  }
 0x131   : > { %2007 = vmatprep.subr.bf16.mxu1 %v4355_v13  ;;  %v4506_v13 = vld [vmem:[#allocation8 + $0x240] ss:$16 sps:$4 sm:$0xff]  }
 0x133   : > { %1983 = vmatpush2.bf16.msra.mxu0 %v4350_v14  ;;  %v4508_v14 = vld [vmem:[#allocation8 + $0x244] ss:$16 sps:$4 sm:$0xff]  }
 0x134   : > { %2008 = vmatpush1.bf16.msra.mxu1 %v4353_v17  ;;  %2034 = vmatprep.subr.bf16.mxu0 %v4361_v19  ;;  %v4433_v17 = vld [vmem:[#allocation8 + $0x1c4] ss:$16 sps:$4 sm:$0xff]  }
 0x135   : > { %2009 = vmatprep.subr.bf16.mxu1 %v4358_v18 }
 0x136   : > { %1985 = vmatmul.mubr.bf16.vlgmr.msra.gmra.mxu0 %v5060_v7  ;;  %v4382_v7 = vld [vmem:[#allocation5 + $0x56c] ss:$16 sps:$4 sm:$0xff]  }
 0x137   : > { %2035 = vmatpush1.bf16.msra.mxu0 %v4359_v21  ;;  %2066 = vmatprep.mubr.bf16.mxu0 %v4844_v16  ;;  %v4391_v16 = vld [vmem:[#allocation5 + $0x64c] ss:$16 sps:$4 sm:$0xff]  }
 0x138   : > { %2010 = vmatpush2.bf16.msra.mxu1 %v4356_v20  ;;  %2036 = vmatprep.subr.bf16.mxu0 %v4367_v23  ;;  %v4431_v20 = vld [vmem:[#allocation8 + $0x1c0] ss:$16 sps:$4 sm:$0xff]   ;;  %v4436_v23 = vld [vmem:[#allocation8 + $0x1a4] ss:$16 sps:$4 sm:$0xff]  }
 0x139   : > { %2011 = vmatprep.subr.bf16.mxu1 %v4364_v22 }
 0x13b   : > { %2037 = vmatpush1.bf16.msra.mxu0 %v4365_v25  ;;  %v4512_v25 = vld [vmem:[#allocation8 + $0x220] ss:$16 sps:$4 sm:$0xff]  }
 0x13c   : > { %2012 = vmatpush2.bf16.msra.mxu1 %v4362_v24  ;;  %2038 = vmatprep.subr.bf16.mxu0 %v4373_v27  ;;  %v4514_v24 = vld [vmem:[#allocation8 + $0x224] ss:$16 sps:$4 sm:$0xff]  }
 0x13d   : > { %2013 = vmatprep.subr.bf16.mxu1 %v4370_v26 }
 0x13f   : > { %2039 = vmatpush1.bf16.msra.mxu0 %v4371_v29 }
 0x140   : > { %2014 = vmatpush2.bf16.msra.mxu1 %v4368_v28  ;;  %2040 = vmatprep.subr.bf16.mxu0 %v4379_v31  ;;  %v4434_v28 = vld [vmem:[#allocation8 + $0x1a0] ss:$16 sps:$4 sm:$0xff]   ;;  %v4439_v31 = vld [vmem:[#allocation8 + $0x184] ss:$16 sps:$4 sm:$0xff]  }
 0x141   : > { %2015 = vmatprep.subr.bf16.mxu1 %v4376_v30 }
 0x143   : > { %2041 = vmatpush1.bf16.msra.mxu0 %v4377_v33  ;;  %v4520_v33 = vld [vmem:[#allocation8 + $0x204] ss:$16 sps:$4 sm:$0xff]  }
 0x144   : > { %2016 = vmatpush2.bf16.msra.mxu1 %v4374_v32  ;;  %2042 = vmatprep.subr.bf16.mxu0 %v4385_v51  ;;  %v4518_v32 = vld [vmem:[#allocation8 + $0x200] ss:$16 sps:$4 sm:$0xff]  }
 0x145   : > { %2017 = vmatprep.subr.bf16.mxu1 %v4382_v7  ;;  %v4437_v7 = vld [vmem:[#allocation8 + $0x180] ss:$16 sps:$4 sm:$0xff]  }
 0x146   : > { %v4524_v51 = vld [vmem:[#allocation8 + $0x3e0] ss:$16 sps:$4 sm:$0xff]  }
 0x147   : > { %2043 = vmatpush1.bf16.msra.mxu0 %v4383_v36  ;;  %v4442_v36 = vld [vmem:[#allocation8 + $0x164] ss:$16 sps:$4 sm:$0xff]  }
 0x148   : > { %2018 = vmatpush2.bf16.msra.mxu1 %v4380_v34  ;;  %2044 = vmatprep.subr.bf16.mxu0 %v4391_v16  ;;  %v4526_v34 = vld [vmem:[#allocation8 + $0x3e4] ss:$16 sps:$4 sm:$0xff]   ;;  %v4440_v16 = vld [vmem:[#allocation8 + $0x160] ss:$16 sps:$4 sm:$0xff]  }
 0x149   : > { %2019 = vmatprep.subr.bf16.mxu1 %v4388_v37  ;;  %v4529_v37 = vld [vmem:[#allocation8 + $0x3c4] ss:$16 sps:$4 sm:$0xff]  }
 0x14b   : > { %2045 = vmatpush1.bf16.msra.mxu0 %v4389_v39  ;;  %v4445_v39 = vld [vmem:[#allocation8 + $0x144] ss:$16 sps:$4 sm:$0xff]  }
 0x14c   : > { %2020 = vmatpush2.bf16.msra.mxu1 %v4386_v38  ;;  %2046 = vmatprep.subr.bf16.mxu0 %v4397_v41  ;;  %v4527_v38 = vld [vmem:[#allocation8 + $0x3c0] ss:$16 sps:$4 sm:$0xff]  }
 0x14d   : > { %2021 = vmatprep.subr.bf16.mxu1 %v4394_v40  ;;  %v4532_v40 = vld [vmem:[#allocation8 + $0x3a4] ss:$16 sps:$4 sm:$0xff]   ;;  %v4443_v41 = vld [vmem:[#allocation8 + $0x140] ss:$16 sps:$4 sm:$0xff]  }
 0x14f   : > { %2047 = vmatpush1.bf16.msra.mxu0 %v4395_v43  ;;  %v4448_v43 = vld [vmem:[#allocation8 + $0x124] ss:$16 sps:$4 sm:$0xff]  }
 0x150   : > { %2022 = vmatpush2.bf16.msra.mxu1 %v4392_v42  ;;  %2048 = vmatprep.subr.bf16.mxu0 %v4403_v45  ;;  %v4530_v42 = vld [vmem:[#allocation8 + $0x3a0] ss:$16 sps:$4 sm:$0xff]  }
 0x151   : > { %2023 = vmatprep.subr.bf16.mxu1 %v4400_v44  ;;  %v4535_v44 = vld [vmem:[#allocation8 + $0x384] ss:$16 sps:$4 sm:$0xff]   ;;  %v4446_v45 = vld [vmem:[#allocation8 + $0x120] ss:$16 sps:$4 sm:$0xff]  }
 0x153   : > { %2049 = vmatpush1.bf16.msra.mxu0 %v4401_v48  ;;  %v4451_v48 = vld [vmem:[#allocation8 + $0x104] ss:$16 sps:$4 sm:$0xff]  }
 0x154   : > { %2024 = vmatpush2.bf16.msra.mxu1 %v4398_v46  ;;  %2873 = vmatprep.subr.bf16.mxu0 %v4406_v49  ;;  %v4533_v46 = vld [vmem:[#allocation8 + $0x380] ss:$16 sps:$4 sm:$0xff]   ;;  %v4538_v49 = vld [vmem:[#allocation8 + $0x364] ss:$16 sps:$4 sm:$0xff]  }
 0x155   : > { %2914 = vmatprep.subr.bf16.mxu1 %v4478_v60 }
 0x156   : > { %2067 = vmatmul.mubr.bf16.vlgmr.msra.gmra.mxu0 %v4628_v53  ;;  %v4454_v53 = vld [vmem:[#allocation8 + $0xec] ss:$16 sps:$4 sm:$0xff]  }
 0x157   : > { %2026 = vmatmul.mubr.bf16.vlgmr.msra.gmra.mxu1 %v5077_v15  ;;  %2874 = vmatpush1.bf16.msra.mxu0 %v4404_v50  ;;  %v4416_v15 = vld [vmem:[#allocation8 + $0x60] ss:$16 sps:$4 sm:$0xff]  }
 0x158   : > { %2875 = vmatprep.subr.bf16.mxu0 %v4409_v52  ;;  %2915 = vmatpush1.bf16.msra.mxu1 %v4476_v59  ;;  %v4449_v50 = vld [vmem:[#allocation8 + $0x100] ss:$16 sps:$4 sm:$0xff]  }
 0x159   : > { %2916 = vmatprep.subr.bf16.mxu1 %v4484_v47  ;;  %v4536_v52 = vld [vmem:[#allocation8 + $0x360] ss:$16 sps:$4 sm:$0xff]   ;;  %v4550_v47 = vld [vmem:[#allocation8 + $0x2ec] ss:$16 sps:$4 sm:$0xff]  }
 0x15a   : > { %v4542_v59 = vld [vmem:[#allocation8 + $0x320] ss:$16 sps:$4 sm:$0xff]  }
 0x15b   : > { %2876 = vmatpush1.bf16.msra.mxu0 %v4407_v54  ;;  %v4541_v54 = vld [vmem:[#allocation8 + $0x344] ss:$16 sps:$4 sm:$0xff]  }
 0x15c   : > { %2877 = vmatprep.subr.bf16.mxu0 %v4412_v55  ;;  %2917 = vmatpush1.bf16.msra.mxu1 %v4482_v62  ;;  %v4539_v55 = vld [vmem:[#allocation8 + $0x340] ss:$16 sps:$4 sm:$0xff]  }
 0x15d   : > { %2918 = vmatprep.subr.bf16.mxu1 %v4490_v1  ;;  %v4545_v62 = vld [vmem:[#allocation8 + $0x300] ss:$16 sps:$4 sm:$0xff]   ;;  %v5098_v1 = vld [vmem:[#allocation7] sm:$0xf] }
 0x15f   : > { %2878 = vmatpush1.bf16.msra.mxu0 %v4410_v56 }
 0x160   : > { %2879 = vmatprep.subr.bf16.mxu0 %v4415_v57  ;;  %2919 = vmatpush1.bf16.msra.mxu1 %v4488_v0 }
 0x161   : > { %2920 = vmatprep.subr.bf16.mxu1 %v4496_v35 }
 0x163   : > { %2880 = vmatpush1.bf16.msra.mxu0 %v4413_v58  ;;  %v4544_v58 = vld [vmem:[#allocation8 + $0x324] ss:$16 sps:$4 sm:$0xff]  }
 0x164   : > { %2881 = vmatprep.subr.bf16.mxu0 %v4418_v61  ;;  %2921 = vmatpush1.bf16.msra.mxu1 %v4494_v4 }
 0x165   : > { %2922 = vmatprep.subr.bf16.mxu1 %v4502_v10 }
 0x167   : > { %2882 = vmatpush1.bf16.msra.mxu0 %v4416_v15  ;;  %v4547_v15 = vld [vmem:[#allocation8 + $0x304] ss:$16 sps:$4 sm:$0xff]  }
 0x168   : > { %2883 = vmatprep.subr.bf16.mxu0 %v4421_v6  ;;  %2923 = vmatpush1.bf16.msra.mxu1 %v4500_v9  ;;  %v582_v6 = vlaneseq }
 0x169   : > { %2924 = vmatprep.subr.bf16.mxu1 %v4508_v14 }
 0x16b   : > { %2884 = vmatpush1.bf16.msra.mxu0 %v4419_v63  ;;  %v5095_v63 = vshrl.u32 %v582_v6, 7 }
 0x16c   : > { %2885 = vmatprep.subr.bf16.mxu0 %v4424_v2  ;;  %2925 = vmatpush1.bf16.msra.mxu1 %v4506_v13 }
 0x16d   : > { %2926 = vmatprep.subr.bf16.mxu1 %v4514_v24  ;;  %v584_v0 = vsub.s32 0, %v5095_v63  ;;  %v588_v2 = vsub.s32 1, %v5095_v63 }
 0x16f   : > { %2886 = vmatpush1.bf16.msra.mxu0 %v4422_v3  ;;  %v585_v3 = vrot.slane %v5098_v1, %v584_v0  ;;  %v589_v4 = vrot.slane %v5098_v1, %v588_v2 }
 0x170   : > { %2887 = vmatprep.subr.bf16.mxu0 %v4427_v5  ;;  %2927 = vmatpush1.bf16.msra.mxu1 %v4512_v25 }
 0x171   : > { %2928 = vmatprep.subr.bf16.mxu1 %v4520_v33  ;;  %v4469_v33 = vld [vmem:[#allocation8 + $0x4c] ss:$16 sps:$4 sm:$0xff]  }
 0x173   : > { %2888 = vmatpush1.bf16.msra.mxu0 %v4425_v8 }
 0x174   : > { %2889 = vmatprep.subr.bf16.mxu0 %v4430_v11  ;;  %2929 = vmatpush1.bf16.msra.mxu1 %v4518_v32  ;;  %v4464_v32 = vld [vmem:[#allocation8 + $0x68] ss:$16 sps:$4 sm:$0xff]  }
 0x175   : > { %2930 = vmatprep.subr.bf16.mxu1 %v4526_v34 }
 0x176   : > { %v5087_v18 = vpop.f32.mrf.mxu0 }
 0x177   : > { %v5089_v19 = vpop.f32.mrf.mxu1  ;;  %2890 = vmatpush2.bf16.msra.mxu0 %v4428_v12  ;;  %v1782_v35 = vadd.f32 %v5087_v18, %v585_v3  ;;  %v4457_v18 = vld [vmem:[#allocation8 + $0xcc] ss:$16 sps:$4 sm:$0xff]  }
 0x178   : > { %v5091_v21 = vpop.f32.mrf.mxu0  ;;  %2891 = vmatprep.subr.bf16.mxu0 %v4433_v17  ;;  %2931 = vmatpush2.bf16.msra.mxu1 %v4524_v51  ;;  %v4472_v51 = vld [vmem:[#allocation8 + $0x2c] ss:$16 sps:$4 sm:$0xff]  }
 0x179   : > { %v5093_v22 = vpop.f32.mrf.mxu1  ;;  %2932 = vmatprep.subr.bf16.mxu1 %v4529_v37  ;;  %v1784_v5 = vadd.f32 %v5091_v21, %v589_v4  ;;  %v1823_v8 = vadd.f32 %v5089_v19, %v1782_v35  ;;  %v4455_v19 = vld [vmem:[#allocation8 + $0xc8] ss:$16 sps:$4 sm:$0xff]   ;;  %v4460_v21 = vld [vmem:[#allocation8 + $0xac] ss:$16 sps:$4 sm:$0xff]  }
 0x17a   : > { %v1785_v26 = vpop.f32.mrf.mxu0 }
 0x17b   : > { %v1826_v27 = vpop.f32.mrf.mxu1  ;;  %2892 = vmatpush2.bf16.msra.mxu0 %v4431_v20  ;;  %v1825_v10 = vadd.f32 %v5093_v22, %v1784_v5  ;;  %v4458_v22 = vld [vmem:[#allocation8 + $0xa8] ss:$16 sps:$4 sm:$0xff]  }
 0x17c   : > { %v1786_v29 = vpop.f32.mrf.mxu0  ;;  %2893 = vmatprep.subr.bf16.mxu0 %v4436_v23  ;;  %2933 = vmatpush2.bf16.msra.mxu1 %v4527_v38  ;;  %v4452_v27 = vld [vmem:[#allocation8 + $0xe8] ss:$16 sps:$4 sm:$0xff]  }
 0x17d   : > { %v1827_v30 = vpop.f32.mrf.mxu1  ;;  %2934 = vmatprep.subr.bf16.mxu1 %v4532_v40  ;;  %v4463_v29 = vld [vmem:[#allocation8 + $0x8c] ss:$16 sps:$4 sm:$0xff]  }
 0x17e   : > { %v4461_v30 = vld [vmem:[#allocation8 + $0x88] ss:$16 sps:$4 sm:$0xff]  }
 0x17f   : > { %2894 = vmatpush2.bf16.msra.mxu0 %v4434_v28 }
 0x180   : > { %2895 = vmatprep.subr.bf16.mxu0 %v4439_v31  ;;  %2935 = vmatpush2.bf16.msra.mxu1 %v4530_v42  ;;  %v4466_v31 = vld [vmem:[#allocation8 + $0x6c] ss:$16 sps:$4 sm:$0xff]   ;;  %v4479_v42 = vld [vmem:[#allocation8 + $0x1e8] ss:$16 sps:$4 sm:$0xff]  }
 0x181   : > { %2936 = vmatprep.subr.bf16.mxu1 %v4535_v44  ;;  %v4485_v44 = vld [vmem:[#allocation8 + $0x1c8] ss:$16 sps:$4 sm:$0xff]  }
 0x183   : > { %2896 = vmatpush2.bf16.msra.mxu0 %v4437_v7  ;;  %v4467_v7 = vld [vmem:[#allocation8 + $0x48] ss:$16 sps:$4 sm:$0xff]  }
 0x184   : > { %2897 = vmatprep.subr.bf16.mxu0 %v4442_v36  ;;  %2937 = vmatpush2.bf16.msra.mxu1 %v4533_v46  ;;  %v4470_v36 = vld [vmem:[#allocation8 + $0x28] ss:$16 sps:$4 sm:$0xff]  }
 0x185   : > { %2938 = vmatprep.subr.bf16.mxu1 %v4538_v49  ;;  %v4491_v46 = vld [vmem:[#allocation8 + $0x1a8] ss:$16 sps:$4 sm:$0xff]  }
 0x186   : > { %v4497_v49 = vld [vmem:[#allocation8 + $0x188] ss:$16 sps:$4 sm:$0xff]  }
 0x187   : > { %2898 = vmatpush2.bf16.msra.mxu0 %v4440_v16  ;;  %v4475_v16 = vld [vmem:[#allocation8 + $0xc] ss:$16 sps:$4 sm:$0xff]  }
 0x188   : > { %2899 = vmatprep.subr.bf16.mxu0 %v4445_v39  ;;  %2939 = vmatpush2.bf16.msra.mxu1 %v4536_v52  ;;  %v4473_v39 = vld [vmem:[#allocation8 + $0x8] ss:$16 sps:$4 sm:$0xff]  }
 0x189   : > { %2940 = vmatprep.subr.bf16.mxu1 %v4541_v54  ;;  %v4503_v52 = vld [vmem:[#allocation8 + $0x168] ss:$16 sps:$4 sm:$0xff]  }
 0x18a   : > { %v4509_v54 = vld [vmem:[#allocation8 + $0x148] ss:$16 sps:$4 sm:$0xff]  }
 0x18b   : > { %2900 = vmatpush2.bf16.msra.mxu0 %v4443_v41  ;;  %v4481_v41 = vld [vmem:[#allocation8 + $0x1ec] ss:$16 sps:$4 sm:$0xff]  }
 0x18c   : > { %2901 = vmatprep.subr.bf16.mxu0 %v4448_v43  ;;  %2941 = vmatpush2.bf16.msra.mxu1 %v4539_v55  ;;  %v4487_v43 = vld [vmem:[#allocation8 + $0x1cc] ss:$16 sps:$4 sm:$0xff]  }
 0x18d   : > { %2942 = vmatprep.subr.bf16.mxu1 %v4544_v58  ;;  %v4517_v55 = vld [vmem:[#allocation8 + $0x12c] ss:$16 sps:$4 sm:$0xff]  }
 0x18f   : > { %2902 = vmatpush2.bf16.msra.mxu0 %v4446_v45  ;;  %v4493_v45 = vld [vmem:[#allocation8 + $0x1ac] ss:$16 sps:$4 sm:$0xff]  }
 0x190   : > { %2903 = vmatprep.subr.bf16.mxu0 %v4451_v48  ;;  %2943 = vmatpush2.bf16.msra.mxu1 %v4542_v59  ;;  %v4499_v48 = vld [vmem:[#allocation8 + $0x18c] ss:$16 sps:$4 sm:$0xff]  }
 0x191   : > { %2944 = vmatprep.subr.bf16.mxu1 %v4547_v15  ;;  %v4523_v59 = vld [vmem:[#allocation8 + $0x10c] ss:$16 sps:$4 sm:$0xff]  }
 0x193   : > { %2904 = vmatpush2.bf16.msra.mxu0 %v4449_v50  ;;  %v4505_v50 = vld [vmem:[#allocation8 + $0x16c] ss:$16 sps:$4 sm:$0xff]  }
 0x194   : > { %2955 = vmatprep.subr.bf16.mxu0 %v4454_v53  ;;  %2945 = vmatpush2.bf16.msra.mxu1 %v4545_v62  ;;  %v4511_v53 = vld [vmem:[#allocation8 + $0x14c] ss:$16 sps:$4 sm:$0xff]   ;;  %v592_v62 = vsub.s32 2, %v5095_v63 }
 0x195   : > { %2996 = vmatprep.subr.bf16.mxu1 %v4550_v47  ;;  %v596_v47 = vsub.s32 3, %v5095_v63 }
 0x196   : > { %v593_v6 = vrot.slane %v5098_v1, %v592_v62 }
 0x197   : > { %v1904_v56 = vpop.f32.mrf.mxu1  ;;  %v597_v3 = vrot.slane %v5098_v1, %v596_v47  ;;  %v4548_v1 = vld [vmem:[#allocation8 + $0x2e8] ss:$16 sps:$4 sm:$0xff]  }
 0x199   : > { %v1906_v57 = vpop.f32.mrf.mxu1 }
 0x19b   : > { %v1908_v60 = vpop.f32.mrf.mxu1 }
 0x19d   : > { %v1909_v61 = vpop.f32.mrf.mxu1 }
 0x19e   : > { %v4521_v61 = vld [vmem:[#allocation8 + $0x108] ss:$16 sps:$4 sm:$0xff]  }
 0x1b6   : > { %v1863_v9 = vpop.f32.mrf.mxu0 }
 0x1b7   : > { %v1864_v11 = vadd.f32 %v1863_v9, %v1823_v8 }
 0x1b8   : > { %v1865_v12 = vpop.f32.mrf.mxu0 }
 0x1b9   : > { %v1905_v13 = vadd.f32 %v1904_v56, %v1864_v11  ;;  %v1866_v14 = vadd.f32 %v1865_v12, %v1825_v10 }
 0x1ba   : > { %v1867_v17 = vpop.f32.mrf.mxu0 }
 0x1bb   : > { %v1907_v20 = vadd.f32 %v1906_v57, %v1866_v14  ;;  %v2075_v23 = vmax.f32 %v1905_v13, 0.0  ;;  %v4515_v57 = vld [vmem:[#allocation8 + $0x128] ss:$16 sps:$4 sm:$0xff]  }
 0x1bc   : > { %v1868_v24 = vpop.f32.mrf.mxu0 }
 0x1bd   : > { %v2076_v25 = vmax.f32 %v1907_v20, 0.0  ;;  %v5111_v28 = vpack.c.bf16 %v2075_v23, %v2075_v23 }
 0x1bf   : > { %v2080_v26 = vpack.c.bf16 %v2076_v25, %v2076_v25 }
 0x1c1   : > { %2905 = vmatprep.mubr.bf16.mxu0 %v2080_v26 }
 0x1c2   : > { %2906 = vmatmul.mubr.bf16.vlgmr.msra.gmra.mxu0 %v5111_v28 }
 0x1c3   : > { %2956 = vmatpush1.bf16.msra.mxu0 %v4452_v27  ;;  %2987 = vmatprep.mubr.bf16.mxu0 %v2080_v26 }
 0x1c4   : > { %2957 = vmatprep.subr.bf16.mxu0 %v4457_v18 }
 0x1c7   : > { %2958 = vmatpush1.bf16.msra.mxu0 %v4455_v19 }
 0x1c8   : > { %2959 = vmatprep.subr.bf16.mxu0 %v4460_v21  ;;  %v4553_v21 = vld [vmem:[#allocation8 + $0x2cc] ss:$16 sps:$4 sm:$0xff]  }
 0x1cb   : > { %2960 = vmatpush1.bf16.msra.mxu0 %v4458_v22  ;;  %v4551_v22 = vld [vmem:[#allocation8 + $0x2c8] ss:$16 sps:$4 sm:$0xff]  }
 0x1cc   : > { %2961 = vmatprep.subr.bf16.mxu0 %v4463_v29  ;;  %v4556_v29 = vld [vmem:[#allocation8 + $0x2ac] ss:$16 sps:$4 sm:$0xff]  }
 0x1cf   : > { %2962 = vmatpush1.bf16.msra.mxu0 %v4461_v30  ;;  %v4554_v30 = vld [vmem:[#allocation8 + $0x2a8] ss:$16 sps:$4 sm:$0xff]  }
 0x1d0   : > { %2963 = vmatprep.subr.bf16.mxu0 %v4466_v31  ;;  %v4559_v31 = vld [vmem:[#allocation8 + $0x28c] ss:$16 sps:$4 sm:$0xff]  }
 0x1d3   : > { %2964 = vmatpush1.bf16.msra.mxu0 %v4464_v32  ;;  %v4557_v32 = vld [vmem:[#allocation8 + $0x288] ss:$16 sps:$4 sm:$0xff]  }
 0x1d4   : > { %2965 = vmatprep.subr.bf16.mxu0 %v4469_v33  ;;  %v4562_v33 = vld [vmem:[#allocation8 + $0x26c] ss:$16 sps:$4 sm:$0xff]  }
 0x1d7   : > { %v1945_v34 = vpop.f32.mrf.mxu1  ;;  %2966 = vmatpush1.bf16.msra.mxu0 %v4467_v7  ;;  %v4560_v7 = vld [vmem:[#allocation8 + $0x268] ss:$16 sps:$4 sm:$0xff]  }
 0x1d8   : > { %2967 = vmatprep.subr.bf16.mxu0 %v4472_v51  ;;  %v1946_v4 = vadd.f32 %v1945_v34, %v593_v6  ;;  %v4565_v51 = vld [vmem:[#allocation8 + $0x24c] ss:$16 sps:$4 sm:$0xff]   ;;  %v4563_v34 = vld [vmem:[#allocation8 + $0x248] ss:$16 sps:$4 sm:$0xff]  }
 0x1d9   : > { %v1947_v37 = vpop.f32.mrf.mxu1  ;;  %v4590_v6 = vld [vmem:[#allocation8 + $0x328] ss:$16 sps:$4 sm:$0xff]  }
 0x1da   : > { %v1948_v35 = vadd.f32 %v1947_v37, %v597_v3  ;;  %v4566_v37 = vld [vmem:[#allocation8 + $0x228] ss:$16 sps:$4 sm:$0xff]  }
 0x1db   : > { %v1949_v38 = vpop.f32.mrf.mxu1  ;;  %2968 = vmatpush1.bf16.msra.mxu0 %v4470_v36  ;;  %v4568_v36 = vld [vmem:[#allocation8 + $0x22c] ss:$16 sps:$4 sm:$0xff]  }
 0x1dc   : > { %2969 = vmatprep.subr.bf16.mxu0 %v4475_v16  ;;  %v4571_v16 = vld [vmem:[#allocation8 + $0x20c] ss:$16 sps:$4 sm:$0xff]   ;;  %v4569_v38 = vld [vmem:[#allocation8 + $0x208] ss:$16 sps:$4 sm:$0xff]  }
 0x1dd   : > { %v1950_v40 = vpop.f32.mrf.mxu1  ;;  %v4605_v3 = vld [vmem:[#allocation10 + $0x18] sm:$0xff]  }
 0x1de   : > { %v4572_v40 = vld [vmem:[#allocation8 + $0x3e8] ss:$16 sps:$4 sm:$0xff]  }
 0x1df   : > { %2970 = vmatpush1.bf16.msra.mxu0 %v4473_v39  ;;  %v4574_v39 = vld [vmem:[#allocation8 + $0x3ec] ss:$16 sps:$4 sm:$0xff]  }
 0x1e0   : > { %2971 = vmatprep.subr.bf16.mxu0 %v4481_v41  ;;  %v4577_v41 = vld [vmem:[#allocation8 + $0x3cc] ss:$16 sps:$4 sm:$0xff]  }
 0x1e3   : > { %2972 = vmatpush2.bf16.msra.mxu0 %v4479_v42  ;;  %v4575_v42 = vld [vmem:[#allocation8 + $0x3c8] ss:$16 sps:$4 sm:$0xff]  }
 0x1e4   : > { %2973 = vmatprep.subr.bf16.mxu0 %v4487_v43  ;;  %v4580_v43 = vld [vmem:[#allocation8 + $0x3ac] ss:$16 sps:$4 sm:$0xff]  }
 0x1e7   : > { %2974 = vmatpush2.bf16.msra.mxu0 %v4485_v44  ;;  %v4578_v44 = vld [vmem:[#allocation8 + $0x3a8] ss:$16 sps:$4 sm:$0xff]  }
 0x1e8   : > { %2975 = vmatprep.subr.bf16.mxu0 %v4493_v45  ;;  %v4583_v45 = vld [vmem:[#allocation8 + $0x38c] ss:$16 sps:$4 sm:$0xff]  }
 0x1eb   : > { %2976 = vmatpush2.bf16.msra.mxu0 %v4491_v46  ;;  %v4596_v46 = vld [vmem:[#allocation10 + $0x78] sm:$0xff]  }
 0x1ec   : > { %2977 = vmatprep.subr.bf16.mxu0 %v4499_v48  ;;  %v4597_v48 = vld [vmem:[#allocation10 + $0x38] sm:$0xff]  }
 0x1ef   : > { %2978 = vmatpush2.bf16.msra.mxu0 %v4497_v49  ;;  %v4598_v49 = vld [vmem:[#allocation10 + $0x70] sm:$0xff]  }
 0x1f0   : > { %2979 = vmatprep.subr.bf16.mxu0 %v4505_v50  ;;  %v4581_v50 = vld [vmem:[#allocation8 + $0x388] ss:$16 sps:$4 sm:$0xff]  }
 0x1f3   : > { %2980 = vmatpush2.bf16.msra.mxu0 %v4503_v52  ;;  %v4599_v52 = vld [vmem:[#allocation10 + $0x30] sm:$0xff]  }
 0x1f4   : > { %2981 = vmatprep.subr.bf16.mxu0 %v4511_v53  ;;  %v4586_v53 = vld [vmem:[#allocation8 + $0x36c] ss:$16 sps:$4 sm:$0xff]  }
 0x1f6   : > { %v1986_v56 = vpop.f32.mrf.mxu0 }
 0x1f7   : > { %2982 = vmatpush2.bf16.msra.mxu0 %v4509_v54  ;;  %v1987_v5 = vadd.f32 %v1986_v56, %v1946_v4  ;;  %v4600_v54 = vld [vmem:[#allocation10 + $0x68] sm:$0xff]  }
 0x1f8   : > { %v1988_v58 = vpop.f32.mrf.mxu0  ;;  %2983 = vmatprep.subr.bf16.mxu0 %v4517_v55  ;;  %v4584_v55 = vld [vmem:[#allocation8 + $0x368] ss:$16 sps:$4 sm:$0xff]   ;;  %v4595_v4 = vld [vmem:[#allocation8 + $0x30c] ss:$16 sps:$4 sm:$0xff]  }
 0x1f9   : > { %v1989_v10 = vadd.f32 %v1988_v58, %v1948_v35  ;;  %v4601_v56 = vld [vmem:[#allocation10 + $0x28] sm:$0xff]   ;;  %v4602_v58 = vld [vmem:[#allocation10 + $0x60] sm:$0xff]   ;;  %v4606_v35 = vld [vmem:[#allocation10 + $0x50] sm:$0xff]  }
 0x1fa   : > { %v1990_v60 = vpop.f32.mrf.mxu0 }
 0x1fb   : > { %2984 = vmatpush2.bf16.msra.mxu0 %v4515_v57  ;;  %v4589_v57 = vld [vmem:[#allocation8 + $0x34c] ss:$16 sps:$4 sm:$0xff]   ;;  %v4603_v60 = vld [vmem:[#allocation10 + $0x20] sm:$0xff]  }
 0x1fc   : > { %v1991_v15 = vpop.f32.mrf.mxu0  ;;  %2985 = vmatprep.subr.bf16.mxu0 %v4523_v59  ;;  %v4587_v59 = vld [vmem:[#allocation8 + $0x348] ss:$16 sps:$4 sm:$0xff]  }
 0x1fd   : > { %v4604_v15 = vld [vmem:[#allocation10 + $0x58] sm:$0xff]  }
 0x1ff   : > { %2986 = vmatpush2.bf16.msra.mxu0 %v4521_v61  ;;  %v4592_v61 = vld [vmem:[#allocation8 + $0x32c] ss:$16 sps:$4 sm:$0xff]  }
 0x200   : > { %3922 = vmatprep.subr.bf16.mxu0 %v4596_v46 }
 0x202   : > { %2988 = vmatmul.mubr.bf16.vlgmr.msra.gmra.mxu0 %v5111_v28 }
 0x203   : > { %3923 = vmatpush3.bf16.msra.mxu0 %v4597_v48 }
 0x204   : > { %3924 = vmatprep.subr.bf16.mxu0 %v4598_v49 }
 0x207   : > { %3925 = vmatpush3.bf16.msra.mxu0 %v4599_v52 }
 0x208   : > { %3926 = vmatprep.subr.bf16.mxu0 %v4600_v54 }
 0x20b   : > { %3927 = vmatpush3.bf16.msra.mxu0 %v4601_v56 }
 0x20c   : > { %3928 = vmatprep.subr.bf16.mxu0 %v4602_v58 }
 0x20f   : > { %3929 = vmatpush3.bf16.msra.mxu0 %v4603_v60 }
 0x210   : > { %3930 = vmatprep.subr.bf16.mxu0 %v4604_v15 }
 0x213   : > { %3931 = vmatpush3.bf16.msra.mxu0 %v4605_v3 }
 0x214   : > { %3932 = vmatprep.subr.bf16.mxu0 %v4606_v35 }
 0x216   : > { %v2068_v9 = vpop.f32.mrf.mxu0 }
 0x217   : > { %v2027_v8 = vpop.f32.mrf.mxu1 }
 0x218   : > { %v2028_v11 = vadd.f32 %v2027_v8, %v1987_v5  ;;  %v2070_v13 = vpop.f32.mrf.mxu0  ;;  %v4593_v5 = vld [vmem:[#allocation8 + $0x308] ss:$16 sps:$4 sm:$0xff]   ;;  %v4607_v8 = vld [vmem:[#allocation10 + $0x10] sm:$0xff]  }
 0x219   : > { %v2029_v12 = vpop.f32.mrf.mxu1  ;;  %3933 = vmatpush3.bf16.msra.mxu0 %v4607_v8 }
 0x21a   : > { %v2069_v14 = vadd.f32 %v2068_v9, %v2028_v11  ;;  %v2030_v17 = vadd.f32 %v2029_v12, %v1989_v10  ;;  %v2072_v23 = vpop.f32.mrf.mxu0  ;;  %v4608_v9 = vld [vmem:[#allocation10 + $0x48] sm:$0xff]   ;;  %v4610_v11 = vld [vmem:[#allocation10 + $0x40] sm:$0xff]  }
 0x21b   : > { %v2031_v20 = vpop.f32.mrf.mxu1  ;;  %v4609_v10 = vld [vmem:[#allocation10 + $0x8] sm:$0xff]   ;;  %3934 = vmatprep.subr.bf16.mxu0 %v4608_v9  ;;  %v4611_v12 = vld [vmem:[#allocation10] sm:$0xff]  }
 0x21c   : > { %v2071_v24 = vadd.f32 %v2070_v13, %v2030_v17  ;;  %v2077_v25 = vmax.f32 %v2069_v14, 0.0  ;;  %v2073_v27 = vpop.f32.mrf.mxu0  ;;  %v4612_v13 = vld [vmem:[#allocation10 + $0xf8] sm:$0xff]   ;;  %v4614_v17 = vld [vmem:[#allocation10 + $0xf0] sm:$0xff]   ;;  %v4616_v23 = vld [vmem:[#allocation10 + $0xe8] sm:$0xff]  }
 0x21d   : > { %v2032_v26 = vpop.f32.mrf.mxu1  ;;  %3935 = vmatpush3.bf16.msra.mxu0 %v4609_v10  ;;  %v4613_v14 = vld [vmem:[#allocation10 + $0xb8] sm:$0xff]   ;;  %v4615_v20 = vld [vmem:[#allocation10 + $0xb0] sm:$0xff]  }
 0x21e   : > { %v2078_v28 = vmax.f32 %v2071_v24, 0.0  ;;  %v5123_v19 = vpack.c.bf16 %v2077_v25, %v2077_v25  ;;  %3936 = vmatprep.subr.bf16.mxu0 %v4610_v11  ;;  %v4617_v24 = vld [vmem:[#allocation10 + $0xa8] sm:$0xff]   ;;  %v4618_v25 = vld [vmem:[#allocation10 + $0xe0] sm:$0xff]   ;;  %v4620_v27 = vld [vmem:[#allocation10 + $0xd8] sm:$0xff]  }
 0x21f   : > { %v4619_v26 = vld [vmem:[#allocation10 + $0xa0] sm:$0xff]  }
 0x220   : > { %v2082_v18 = vpack.c.bf16 %v2078_v28, %v2078_v28  ;;  %v4621_v28 = vld [vmem:[#allocation10 + $0x98] sm:$0xff]  }
 0x221   : > { %3937 = vmatpush3.bf16.msra.mxu0 %v4611_v12 }
 0x222   : > { %2946 = vmatprep.mubr.bf16.mxu1 %v2082_v18 }
 0x223   : > { %2947 = vmatmul.mubr.bf16.vlgmr.msra.gmra.mxu1 %v5123_v19 }
 0x224   : > { %2997 = vmatpush1.bf16.msra.mxu1 %v4548_v1  ;;  %3028 = vmatprep.mubr.bf16.mxu1 %v2082_v18  ;;  %v4622_v18 = vld [vmem:[#allocation10 + $0xd0] sm:$0xff]  }
 0x225   : > { %2998 = vmatprep.subr.bf16.mxu1 %v4553_v21  ;;  %v4623_v1 = vld [vmem:[#allocation10 + $0x90] sm:$0xff]  }
 0x228   : > { %2999 = vmatpush1.bf16.msra.mxu1 %v4551_v22 }
 0x229   : > { %3000 = vmatprep.subr.bf16.mxu1 %v4556_v29 }
 0x22c   : > { %3001 = vmatpush1.bf16.msra.mxu1 %v4554_v30  ;;  %v4624_v30 = vld [vmem:[#allocation10 + $0xc8] sm:$0xff]  }
 0x22d   : > { %3002 = vmatprep.subr.bf16.mxu1 %v4559_v31  ;;  %v4625_v31 = vld [vmem:[#allocation10 + $0x88] sm:$0xff]  }
 0x230   : > { %3003 = vmatpush1.bf16.msra.mxu1 %v4557_v32  ;;  %v4626_v32 = vld [vmem:[#allocation10 + $0xc0] sm:$0xff]  }
 0x231   : > { %3004 = vmatprep.subr.bf16.mxu1 %v4562_v33  ;;  %v4627_v33 = vld [vmem:[#allocation10 + $0x80] sm:$0xff]  }
 0x234   : > { %3005 = vmatpush1.bf16.msra.mxu1 %v4560_v7 }
 0x235   : > { %3006 = vmatprep.subr.bf16.mxu1 %v4565_v51 }
 0x238   : > { %3007 = vmatpush1.bf16.msra.mxu1 %v4563_v34 }
 0x239   : > { %3008 = vmatprep.subr.bf16.mxu1 %v4568_v36 }
 0x23c   : > { %3009 = vmatpush1.bf16.msra.mxu1 %v4566_v37  ;;  %v2211_v37 = vld [vmem:[%s5181_s4] sm:$0xf] }
 0x23d   : > { %3010 = vmatprep.subr.bf16.mxu1 %v4571_v16  ;;  %v2216_v16 = vrot.slane %v2211_v37, %v584_v0  ;;  %v2224_v0 = vrot.slane %v2211_v37, %v592_v62 }
 0x240   : > { %3011 = vmatpush1.bf16.msra.mxu1 %v4569_v38  ;;  %v2220_v38 = vrot.slane %v2211_v37, %v588_v2  ;;  %v2228_v2 = vrot.slane %v2211_v37, %v596_v47 }
 0x241   : > { %3012 = vmatprep.subr.bf16.mxu1 %v4574_v39 }
 0x244   : > { %3013 = vmatpush2.bf16.msra.mxu1 %v4572_v40 }
 0x245   : > { %3014 = vmatprep.subr.bf16.mxu1 %v4577_v41 }
 0x248   : > { %3015 = vmatpush2.bf16.msra.mxu1 %v4575_v42 }
 0x249   : > { %3016 = vmatprep.subr.bf16.mxu1 %v4580_v43 }
 0x24c   : > { %3017 = vmatpush2.bf16.msra.mxu1 %v4578_v44 }
 0x24d   : > { %3018 = vmatprep.subr.bf16.mxu1 %v4583_v45 }
 0x250   : > { %3019 = vmatpush2.bf16.msra.mxu1 %v4581_v50 }
 0x251   : > { %3020 = vmatprep.subr.bf16.mxu1 %v4586_v53 }
 0x254   : > { %3021 = vmatpush2.bf16.msra.mxu1 %v4584_v55 }
 0x255   : > { %3022 = vmatprep.subr.bf16.mxu1 %v4589_v57 }
 0x258   : > { %3023 = vmatpush2.bf16.msra.mxu1 %v4587_v59 }
 0x259   : > { %3024 = vmatprep.subr.bf16.mxu1 %v4592_v61 }
 0x25c   : > { %3025 = vmatpush2.bf16.msra.mxu1 %v4590_v6 }
 0x25d   : > { %3026 = vmatprep.subr.bf16.mxu1 %v4595_v4 }
 0x260   : > { %3027 = vmatpush2.bf16.msra.mxu1 %v4593_v5  ;;  %v3885_v5 = vld [vmem:[%s5183_s6] ss:$0 sm:$0xff] }
 0x261   : > { %3944 = vmatprep.subr.bf16.mxu1 %v4612_v13 }
 0x263   : > { %3029 = vmatmul.mubr.bf16.vlgmr.msra.gmra.mxu1 %v5123_v19 }
 0x264   : > { %3945 = vmatpush3.bf16.msra.mxu1 %v4613_v14 }
 0x265   : > { %3946 = vmatprep.subr.bf16.mxu1 %v4614_v17 }
 0x268   : > { %3947 = vmatpush3.bf16.msra.mxu1 %v4615_v20 }
 0x269   : > { %3948 = vmatprep.subr.bf16.mxu1 %v4616_v23 }
 0x26c   : > { %3949 = vmatpush3.bf16.msra.mxu1 %v4617_v24 }
 0x26d   : > { %3950 = vmatprep.subr.bf16.mxu1 %v4618_v25 }
 0x270   : > { %3951 = vmatpush3.bf16.msra.mxu1 %v4619_v26 }
 0x271   : > { %3952 = vmatprep.subr.bf16.mxu1 %v4620_v27 }
 0x274   : > { %3953 = vmatpush3.bf16.msra.mxu1 %v4621_v28 }
 0x275   : > { %3954 = vmatprep.subr.bf16.mxu1 %v4622_v18 }
 0x278   : > { %3955 = vmatpush3.bf16.msra.mxu1 %v4623_v1 }
 0x279   : > { %3956 = vmatprep.subr.bf16.mxu1 %v4624_v30 }
 0x27c   : > { %3957 = vmatpush3.bf16.msra.mxu1 %v4625_v31 }
 0x27d   : > { %3958 = vmatprep.subr.bf16.mxu1 %v4626_v32 }
 0x280   : > { %3959 = vmatpush3.bf16.msra.mxu1 %v4627_v33 }
 0x282   : > { %v2907_v19 = vpop.f32.mrf.mxu0 }
 0x283   : > { %v2908_v39 = vadd.f32 %v2907_v19, %v2216_v16 }
 0x284   : > { %v2909_v21 = vpop.f32.mrf.mxu0 }
 0x285   : > { %v2910_v41 = vadd.f32 %v2909_v21, %v2220_v38 }
 0x286   : > { %v2911_v22 = vpop.f32.mrf.mxu0 }
 0x288   : > { %v2912_v29 = vpop.f32.mrf.mxu0 }
 0x2c2   : > { %v2989_v7 = vpop.f32.mrf.mxu0 }
 0x2c3   : > { %v2990_v53 = vadd.f32 %v2989_v7, %v2224_v0 }
 0x2c4   : > { %v2991_v51 = vpop.f32.mrf.mxu0 }
 0x2c5   : > { %v2992_v55 = vadd.f32 %v2991_v51, %v2228_v2 }
 0x2c6   : > { %v2993_v34 = vpop.f32.mrf.mxu0 }
 0x2c8   : > { %v2994_v36 = vpop.f32.mrf.mxu0 }
 0x2e3   : > { %v2948_v40 = vpop.f32.mrf.mxu1 }
 0x2e4   : > { %v2949_v42 = vadd.f32 %v2948_v40, %v2908_v39 }
 0x2e5   : > { %v2950_v43 = vpop.f32.mrf.mxu1 }
 0x2e6   : > { %v2951_v44 = vadd.f32 %v2950_v43, %v2910_v41  ;;  %v3037_v45 = vmax.f32 %v2949_v42, 0.0 }
 0x2e7   : > { %v2952_v46 = vpop.f32.mrf.mxu1 }
 0x2e8   : > { %v3038_v48 = vmax.f32 %v2951_v44, 0.0  ;;  %v3041_v52 = vpack.c.bf16 %v3037_v45, %v3037_v45 }
 0x2e9   : > { %v2953_v49 = vpop.f32.mrf.mxu1 }
 0x2ea   : > { %v3042_v50 = vpack.c.bf16 %v3038_v48, %v3038_v48 }
 0x2ec   : > { %3340 = vmatprep.mubr.bf16.mxu0 %v3042_v50 }
 0x2ed   : > { %3341 = vmatmul.mubr.bf16.vlgmr.msra.gmra.mxu0 %v3041_v52 }
 0x323   : > { %v3030_v54 = vpop.f32.mrf.mxu1 }
 0x324   : > { %v3031_v56 = vadd.f32 %v3030_v54, %v2990_v53 }
 0x325   : > { %v3032_v57 = vpop.f32.mrf.mxu1 }
 0x326   : > { %v3033_v58 = vadd.f32 %v3032_v57, %v2992_v55  ;;  %v3039_v59 = vmax.f32 %v3031_v56, 0.0 }
 0x327   : > { %v3034_v60 = vpop.f32.mrf.mxu1 }
 0x328   : > { %v3040_v61 = vmax.f32 %v3033_v58, 0.0  ;;  %v3043_v3 = vpack.c.bf16 %v3039_v59, %v3039_v59 }
 0x329   : > { %v3035_v15 = vpop.f32.mrf.mxu1 }
 0x32a   : > { %v3044_v6 = vpack.c.bf16 %v3040_v61, %v3040_v61 }
 0x32c   : > { %3380 = vmatprep.mubr.bf16.mxu1 %v3044_v6 }
 0x32d   : > { %3381 = vmatmul.mubr.bf16.vlgmr.msra.gmra.mxu1 %v3043_v3 }
 0x3ad   : > { %v3938_v62 = vpop.f32.mrf.mxu0 }
 0x3af   : > { %v3939_v4 = vpop.f32.mrf.mxu0 }
 0x3b0   : > { %v3940_v35 = vadd.f32 %v3939_v4, %v3938_v62 }
 0x3b1   : > { %v3941_v63 = vpop.f32.mrf.mxu0 }
 0x3b2   : > { %v3343_v10 = vadd.f32 %v3940_v35, %v3885_v5 }
 0x3b3   : > { %v3942_v47 = vpop.f32.mrf.mxu0 }
 0x3ed   : > { %v3960_v8 = vpop.f32.mrf.mxu1 }
 0x3ef   : > { %v3961_v9 = vpop.f32.mrf.mxu1 }
 0x3f0   : > { %v3962_v11 = vadd.f32 %v3961_v9, %v3960_v8 }
 0x3f1   : > { %v3963_v12 = vpop.f32.mrf.mxu1 }
 0x3f2   : > { %v3383_v13 = vadd.f32 %v3962_v11, %v3343_v10 }
 0x3f3   : > { %v3964_v14 = vpop.f32.mrf.mxu1 }
 0x3f4   : > { %v3388_v17 = vmax.f32 %v3383_v13, 0.0 }
 0x3f6   : > { %3389 = vst [vmem:[%s350_s16] sm:$0xff] %v3388_v17 }
 0x3f7   : > { %4774 = shalt.err (!%p4771_p11)
}
 0x3f8   : > { %s4775_s2 = scalar_lea.hbm %s3402_s21, 128  ;;  %s4779_s11 = scalar_lea.hbm %s5184_s7, 256 }
 0x3f9   : > { %p4776_p12 = scmp.ne.s32.totalorder %s3402_s21, %s4775_s2  ;;  %p4780_p4 = scmp.lt.s32.totalorder %s3402_s21, %s5184_s7 }
 0x3fa   : > { %p4781_p13 = scmp.lt.s32.totalorder %s4779_s11, %s4775_s2 }
 0x3fb   : > { %p4777_p1 = pnand %p4776_p12, %p5205_p7 }
 0x3fc   : > { %p4782_p5 = por %p4781_p13, %p4780_p4 }
 0x3fd   : > { %p4778_p3 = pneg %p4777_p1 }
 0x3ff   : > { %p4783_p8 = pnand %p4782_p5, %p4778_p3 }
 0x401   : > { %4786 = shalt.err (!%p4783_p8)
}
 0x402   : > { %3987 = dma.vmem_to_hbm [thread:$0]  (%p5205_p7), %s3405_s12, 128, %s3402_s21, %s3391_s14  }
 0x403 PF: > { %s3416_s15 = sand.u32 1, %s4821_s24   ;;  %p5206_p10 = scmp.ne.s32.totalorder %s5197_s23, 0 }
 0x404   : > { %p5207_p6 = scmp.ge.s32.totalorder %s4833_s27, 2  ;;  %s3417_s16 = scalar_lea.sflag [#allocation4], %s3416_s15 }
 0x406   : > { %p4007_p0 = pnand %p5207_p6, %p5206_p10 }
 0x408   : > { %p4008_p2 = pneg %p4007_p0 }
 0x40a   : > { %4816 = dma.done.wait (%p4008_p2), %s3417_s16, 128  }
 0x40b   : > { %4818 = vsyncadd (%p4008_p2), %s3417_s16, 4294967168  ;;  %p22_p9 = scmp.ge.s32.totalorder %s4975_s17, 4   ;;  %s5208_s24 = smov %s4825_s25 }
 0x40c   : > { %s5209_s25 = smov %s4829_s26  ;;  %s5210_s26 = smov %s4986_s20 }
 0x40d   : > { %s5211_s27 = smov %s4975_s17  ;;  %24 = sbr.rel (!%p22_p9) target bundleno = 10 (0xa), region = 109 }
 0x412   :  { %3422 = vsyncpa [#allocation3], 1 }
 0x413   :  { %3424 = vsyncpa [#allocation3 + $0x1], 1 }
 0x414   :  { %3425 = vsyncpa [#allocation6], 1 }
 0x415   :  { %3426 = vsyncpa [#allocation9], 1 }
 0x416   :  { %3427 = vsyncpa [#allocation4], 1 }
 0x417   :  { %3429 = vsyncpa [#allocation4 + $0x1], 1 }

</bundles_post_ra>
